<compile_context>
chip_gen: v7x
topology: tpu7x:2x2x1
jax: 0.10.0
libtpu: 0.0.40
codegen_flags: <defaults>
</compile_context>

<pallas_src>
import functools
import math

import jax
import jax.numpy as jnp
import numpy as np
from jax.experimental import pallas as pl
from jax.experimental.pallas import tpu as pltpu


# ----------------------------------------------------------------- packing ---

def _round_up(x, m):
    return (x + m - 1) // m * m


def _mab_slab_offsets(din, hidden):
    """Static row offsets inside a packed MAB slab (all 8-aligned)."""
    r1 = _round_up(din + 1, 8)            # start of wo / bo block
    r2 = _round_up(r1 + hidden + 1, 8)    # start of optional extra row (PMA seed)
    return r1, r2


def _pack_mab_slab(p, din, hidden, seed=None):
    """Pack one MAB layer into a single lane-dense (rows, 3*hidden) f32 slab.

    rows [0, din)        : wq | wk | wv   (fused QKV weight)
    row  [din]           : bq | bk | bv   (fused QKV bias)
    rows [r1, r1+hidden) : wo  (cols 0:hidden)
    row  [r1+hidden]     : bo  (cols 0:hidden)
    row  [r2] (optional) : PMA seed S (cols 0:hidden)
    """
    r1, r2 = _mab_slab_offsets(din, hidden)
    rows = r2 if seed is None else _round_up(r2 + 1, 8)
    slab = np.zeros((rows, 3 * hidden), np.float32)
    slab[0:din, 0:hidden] = np.asarray(p["wq"])
    slab[0:din, hidden:2 * hidden] = np.asarray(p["wk"])
    slab[0:din, 2 * hidden:] = np.asarray(p["wv"])
    slab[din, 0:hidden] = np.asarray(p["bq"]).reshape(-1)
    slab[din, hidden:2 * hidden] = np.asarray(p["bk"]).reshape(-1)
    slab[din, 2 * hidden:] = np.asarray(p["bv"]).reshape(-1)
    slab[r1:r1 + hidden, 0:hidden] = np.asarray(p["wo"])
    slab[r1 + hidden, 0:hidden] = np.asarray(p["bo"]).reshape(-1)
    if seed is not None:
        slab[r2, 0:hidden] = np.asarray(seed).reshape(-1)
    return jnp.asarray(slab)


def _pack_out_slab(out_w, out_b, hidden, d_in):
    rows = _round_up(hidden + 1, 8)
    slab = np.zeros((rows, d_in), np.float32)
    slab[0:hidden] = np.asarray(out_w)
    slab[hidden] = np.asarray(out_b).reshape(-1)
    return jnp.asarray(slab)


# ------------------------------------------------------------------ kernel ---

def _split_heads_major(x2, bb, n, num_heads, d):
    """(bb*n, num_heads*d) -> (num_heads*bb, n, d), head-major like torch.cat(split, 0)."""
    pieces = [x2[:, h * d:(h + 1) * d].reshape(bb, n, d) for h in range(num_heads)]
    return jnp.concatenate(pieces, axis=0)


def _merge_heads_major(x3, bb, num_heads):
    """(num_heads*bb, n, d) -> (bb*n, num_heads*d) (matches torch.cat(split(B), 2))."""
    n, d = x3.shape[1], x3.shape[2]
    pieces = [x3[h * bb:(h + 1) * bb] for h in range(num_heads)]
    return jnp.concatenate(pieces, axis=-1).reshape(bb * n, num_heads * d)


def _mab_block(q_rows, k_rows, slab_ref, *, din, hidden, num_heads, bb, nq, nk,
               qk_same, mxu_dtype):
    """MAB over a block of `bb` set elements; rows are flattened on axis 0.

    q_rows: (bb*nq, din), k_rows: (bb*nk, din)  ->  (bb*nq, hidden).
    `slab_ref` is the packed per-layer weight slab (see _pack_mab_slab).
    """
    H = hidden
    d = H // num_heads
    scale = 1.0 / math.sqrt(H)            # reference scales by sqrt(dim_V)
    r1, _ = _mab_slab_offsets(din, H)

    def mm(a, w):                          # MXU matmul; f32 accumulation always
        return jnp.dot(a.astype(mxu_dtype), w.astype(mxu_dtype),
                       preferred_element_type=jnp.float32)

    w_qkv = slab_ref[0:din, :]             # (din, 3H)
    b_qkv = slab_ref[din:din + 1, :]       # (1, 3H)
    wo = slab_ref[r1:r1 + H, 0:H]          # (H, H)
    bo = slab_ref[r1 + H:r1 + H + 1, 0:H]  # (1, H)

    if qk_same:
        # Single fused projection matmul: (bb*n, din) @ (din, 3H).
        qkv = mm(q_rows, w_qkv) + b_qkv
        Q, K, V = qkv[:, 0:H], qkv[:, H:2 * H], qkv[:, 2 * H:]
    else:
        # PMA: queries come from the seed, keys/values from the set features.
        Q = mm(q_rows, w_qkv[:, 0:H]) + b_qkv[:, 0:H]
        kv = mm(k_rows, w_qkv[:, H:]) + b_qkv[:, H:]
        K, V = kv[:, 0:H], kv[:, H:]

    # Head-batched attention: one batched contraction over (num_heads * bb).
    Qb = _split_heads_major(Q, bb, nq, num_heads, d)          # (h*bb, nq, d)
    Kb = _split_heads_major(K, bb, nk, num_heads, d)          # (h*bb, nk, d)
    Vb = _split_heads_major(V, bb, nk, num_heads, d)          # (h*bb, nk, d)

    logits = jnp.einsum("bqd,bkd->bqk", Qb.astype(mxu_dtype), Kb.astype(mxu_dtype),
                        preferred_element_type=jnp.float32) * scale
    logits = logits - jnp.max(logits, axis=-1, keepdims=True)
    p = jnp.exp(logits)
    inv = pl.reciprocal(jnp.sum(p, axis=-1, keepdims=True), approx=True)
    ctx = jnp.einsum("bqk,bkd->bqd", (p * inv).astype(mxu_dtype), Vb.astype(mxu_dtype),
                     preferred_element_type=jnp.float32)       # (h*bb, nq, d)

    O = Q + _merge_heads_major(ctx, bb, num_heads)             # Q_ + A @ V_ (residual)
    Hm = mm(O, wo) + bo
    return O + Hm * jax.nn.sigmoid(Hm)                         # O + swish(fc_o(O))


def _set_transformer_kernel(x_ref, sab1_ref, sab2_ref, pma_ref, sab3_ref, out_slab_ref,
                            o_ref, *, num_heads, batch_block, set_size, d_in, hidden,
                            mxu_dtype):
    bb, n, H = batch_block, set_size, hidden

    # Everything below stays in VMEM / vregs: no intermediate HBM round trips.
    x = x_ref[...].reshape(bb * n, d_in)                               # (bb*n, d_in)

    h = _mab_block(x, x, sab1_ref, din=d_in, hidden=H, num_heads=num_heads,
                   bb=bb, nq=n, nk=n, qk_same=True, mxu_dtype=mxu_dtype)   # SAB 1
    h = _mab_block(h, h, sab2_ref, din=H, hidden=H, num_heads=num_heads,
                   bb=bb, nq=n, nk=n, qk_same=True, mxu_dtype=mxu_dtype)   # SAB 2

    _, r2 = _mab_slab_offsets(H, H)
    seeds = jnp.broadcast_to(pma_ref[r2:r2 + 1, 0:H], (bb, H))         # PMA seed / set
    h = _mab_block(seeds, h, pma_ref, din=H, hidden=H, num_heads=num_heads,
                   bb=bb, nq=1, nk=n, qk_same=False, mxu_dtype=mxu_dtype)  # PMA
    h = _mab_block(h, h, sab3_ref, din=H, hidden=H, num_heads=num_heads,
                   bb=bb, nq=1, nk=1, qk_same=True, mxu_dtype=mxu_dtype)   # decoder SAB

    out_w = out_slab_ref[0:H, :]                                       # (H, d_in)
    out_b = out_slab_ref[H:H + 1, :]                                   # (1, d_in)
    out = (jnp.dot(h.astype(mxu_dtype), out_w.astype(mxu_dtype),
                   preferred_element_type=jnp.float32) + out_b)        # (bb, d_in)
    o_ref[:, 0, :] = out


# ----------------------------------------------------------------- wrapper ---

def set_transformer_forward(x, params, num_heads, *, batch_block=None,
                            mxu_dtype=jnp.float32):
    """Fused SetTransformer forward: x (B, N, dim_in) -> (B, dim_in).

    batch_block=None (default) processes the whole batch in one grid step (best on
    single-TC v5e/v6e).  On v7x pick batch_block = B / (2k) so the "parallel" grid
    splits across both TensorCores.  mxu_dtype=jnp.bfloat16 casts matmul operands
    only (f32 accumulation / elementwise) for the bf16-native MXUs on v6e/v7x.
    """
    B, N, d_in = x.shape
    hidden = params["sab1"]["wq"].shape[1]
    assert hidden % num_heads == 0, "num_heads must divide the hidden dim"
    if batch_block is None:
        batch_block = B
    assert B % batch_block == 0, "batch_block must divide the batch"
    n_blocks = B // batch_block

    # Host-side one-time weight packing (5 lane-dense slabs instead of 36 tensors).
    sab1_slab = _pack_mab_slab(params["sab1"], d_in, hidden)
    sab2_slab = _pack_mab_slab(params["sab2"], hidden, hidden)
    pma_slab = _pack_mab_slab(params["pma_mab"], hidden, hidden, seed=params["pma_S"])
    sab3_slab = _pack_mab_slab(params["sab3"], hidden, hidden)
    out_slab = _pack_out_slab(params["out_w"], params["out_b"], hidden, d_in)

    def const_spec(arr):                   # full slab, same block every grid step
        return pl.BlockSpec(arr.shape, lambda b: (0, 0))

    kernel = functools.partial(
        _set_transformer_kernel, num_heads=num_heads, batch_block=batch_block,
        set_size=N, d_in=d_in, hidden=hidden, mxu_dtype=mxu_dtype)

    out = pl.pallas_call(
        kernel,
        out_shape=jax.ShapeDtypeStruct((B, 1, d_in), jnp.float32),
        grid=(n_blocks,),
        in_specs=[
            pl.BlockSpec((batch_block, N, d_in), lambda b: (b, 0, 0)),  # x (q == k)
            const_spec(sab1_slab),
            const_spec(sab2_slab),
            const_spec(pma_slab),           # includes the PMA seed row
            const_spec(sab3_slab),
            const_spec(out_slab),
        ],
        out_specs=pl.BlockSpec((batch_block, 1, d_in), lambda b: (b, 0, 0)),
        compiler_params=pltpu.CompilerParams(
            dimension_semantics=("parallel",),       # megacore split on v7x
            vmem_limit_bytes=32 * 1024 * 1024),      # explicit budget (v7x: 64 MiB phys)
    )(x, sab1_slab, sab2_slab, pma_slab, sab3_slab, out_slab)
    return jnp.squeeze(out, axis=1)                                    # (B, dim_in)


# ------------------------------------------------------------------- params --

def make_mab_params(key, dim_Q, dim_K, dim_V):
    ks = jax.random.split(key, 4)
    s = lambda fan_in: 1.0 / math.sqrt(fan_in)
    return {
        "wq": jax.random.normal(ks[0], (dim_Q, dim_V), jnp.float32) * s(dim_Q),
        "bq": jnp.zeros((1, dim_V), jnp.float32),
        "wk": jax.random.normal(ks[1], (dim_K, dim_V), jnp.float32) * s(dim_K),
        "bk": jnp.zeros((1, dim_V), jnp.float32),
        "wv": jax.random.normal(ks[2], (dim_K, dim_V), jnp.float32) * s(dim_K),
        "bv": jnp.zeros((1, dim_V), jnp.float32),
        "wo": jax.random.normal(ks[3], (dim_V, dim_V), jnp.float32) * s(dim_V),
        "bo": jnp.zeros((1, dim_V), jnp.float32),
    }


def make_params(key, dim_input, hidden):
    ks = jax.random.split(key, 6)
    return {
        "sab1": make_mab_params(ks[0], dim_input, dim_input, hidden),
        "sab2": make_mab_params(ks[1], hidden, hidden, hidden),
        "pma_S": jax.random.normal(ks[2], (1, 1, hidden), jnp.float32)
                 * math.sqrt(6.0 / (1 + hidden)),                  # xavier_uniform-scale
        "pma_mab": make_mab_params(ks[3], hidden, hidden, hidden),
        "sab3": make_mab_params(ks[4], hidden, hidden, hidden),
        "out_w": jax.random.normal(ks[5], (hidden, dim_input), jnp.float32)
                 * (1.0 / math.sqrt(hidden)),
        "out_b": jnp.zeros((1, dim_input), jnp.float32),
    }


# ---------------------------------------------------------- pure-JAX reference

def mab_ref(q, k, p, num_heads):
    Q = q @ p["wq"] + p["bq"][0]
    K = k @ p["wk"] + p["bk"][0]
    V = k @ p["wv"] + p["bv"][0]
    dV = Q.shape[-1]
    heads = lambda X: jnp.stack(jnp.split(X, num_heads, axis=-1), axis=0)  # (h,B,N,d)
    Qh, Kh, Vh = heads(Q), heads(K), heads(V)
    A = jax.nn.softmax(
        jnp.einsum("hbqd,hbkd->hbqk", Qh, Kh) / math.sqrt(dV), axis=-1)
    O = Qh + jnp.einsum("hbqk,hbkd->hbqd", A, Vh)
    O = jnp.concatenate(list(O), axis=-1)
    Hm = O @ p["wo"] + p["bo"][0]
    return O + Hm * jax.nn.sigmoid(Hm)


def set_transformer_ref(x, params, num_heads):
    B = x.shape[0]
    h = mab_ref(x, x, params["sab1"], num_heads)
    h = mab_ref(h, h, params["sab2"], num_heads)
    seeds = jnp.broadcast_to(params["pma_S"], (B,) + params["pma_S"].shape[1:])
    h = mab_ref(seeds, h, params["pma_mab"], num_heads)
    h = mab_ref(h, h, params["sab3"], num_heads)
    h = h @ params["out_w"] + params["out_b"][0]
    return jnp.squeeze(h, axis=1)


# -------------------------------------------------------------------- main --

if __name__ == "__main__":
    B, N = 2, 8               # batch, set size
    dim_input = 4
    hidden = 32
    num_heads = 4

    key = jax.random.PRNGKey(0)
    k_x, k_p = jax.random.split(key)
    x = jax.random.normal(k_x, (B, N, dim_input), jnp.float32)
    params = make_params(k_p, dim_input, hidden)

    ref = jax.block_until_ready(set_transformer_ref(x, params, num_heads))

    # 1) f32 MXU operands, whole batch in one block (single grid step; v5e/v6e path).
    out = jax.block_until_ready(set_transformer_forward(x, params, num_heads))
    assert out.shape == (B, dim_input), out.shape
    # 1e-2 tolerance only because softmax uses the EUP approximate reciprocal.
    np.testing.assert_allclose(np.asarray(out), np.asarray(ref), rtol=1e-2, atol=1e-2)

    # 2) bf16 MXU operands + batch split over a 2-step "parallel" grid (v6e/v7x path).
    out_bf16 = jax.block_until_ready(
        set_transformer_forward(x, params, num_heads, batch_block=1,
                                mxu_dtype=jnp.bfloat16))
    # Loose sanity tolerance: bf16 operand rounding through 4 layers (~1e-2 relative).
    np.testing.assert_allclose(np.asarray(out_bf16), np.asarray(ref), rtol=1e-1, atol=1e-1)

    print("KERNEL_OK")
</pallas_src>

<mosaic_0001>
module attributes {stable_mosaic.version = 11 : i64} {
  func.func @_set_transformer_kernel(%arg0: i32, %arg1: memref<2x8x4xf32, #tpu.memory_space<vmem>>, %arg2: memref<48x96xf32, #tpu.memory_space<vmem>>, %arg3: memref<80x96xf32, #tpu.memory_space<vmem>>, %arg4: memref<88x96xf32, #tpu.memory_space<vmem>>, %arg5: memref<80x96xf32, #tpu.memory_space<vmem>>, %arg6: memref<40x4xf32, #tpu.memory_space<vmem>>, %arg7: memref<2x1x4xf32, #tpu.memory_space<vmem>>) attributes {dimension_semantics = [#tpu.dimension_semantics<parallel>], iteration_bounds = array<i64: 1>, scalar_prefetch = 0 : i64, scratch_operands = 0 : i64, tpu.core_type = #tpu.core_type<tc>, window_params = [{transform_indices = @transform_0, window_bounds = array<i64: 2, 8, 4>}, {pipeline_mode = #tpu.pipeline_mode<synchronous>, transform_indices = @transform_1, window_bounds = array<i64: 48, 96>}, {pipeline_mode = #tpu.pipeline_mode<synchronous>, transform_indices = @transform_2, window_bounds = array<i64: 80, 96>}, {pipeline_mode = #tpu.pipeline_mode<synchronous>, transform_indices = @transform_3, window_bounds = array<i64: 88, 96>}, {pipeline_mode = #tpu.pipeline_mode<synchronous>, transform_indices = @transform_4, window_bounds = array<i64: 80, 96>}, {pipeline_mode = #tpu.pipeline_mode<synchronous>, transform_indices = @transform_5, window_bounds = array<i64: 40, 4>}, {transform_indices = @transform_6, window_bounds = array<i64: 2, 1, 4>}]} {
    %c0 = arith.constant 0 : index
    %c0_0 = arith.constant 0 : index
    %c0_1 = arith.constant 0 : index
    %0 = vector.load %arg1[%c0, %c0_0, %c0_1] : memref<2x8x4xf32, #tpu.memory_space<vmem>>, vector<2x8x4xf32>
    %1 = vector.shape_cast %0 : vector<2x8x4xf32> to vector<16x4xf32>
    %c0_2 = arith.constant 0 : index
    %c0_3 = arith.constant 0 : index
    %2 = vector.load %arg2[%c0_2, %c0_3] : memref<48x96xf32, #tpu.memory_space<vmem>>, vector<4x96xf32>
    %c4 = arith.constant 4 : index
    %c0_4 = arith.constant 0 : index
    %3 = vector.load %arg2[%c4, %c0_4] : memref<48x96xf32, #tpu.memory_space<vmem>>, vector<1x96xf32>
    %c8 = arith.constant 8 : index
    %c0_5 = arith.constant 0 : index
    %4 = vector.load %arg2[%c8, %c0_5] : memref<48x96xf32, #tpu.memory_space<vmem>>, vector<32x32xf32>
    %c40 = arith.constant 40 : index
    %c0_6 = arith.constant 0 : index
    %5 = vector.load %arg2[%c40, %c0_6] : memref<48x96xf32, #tpu.memory_space<vmem>>, vector<1x32xf32>
    %cst = arith.constant dense<0.000000e+00> : vector<16x96xf32>
    %6 = tpu.matmul %1, %2, %cst {dimension_numbers = #tpu.dot_dimension_numbers<[1], [0], [0], [1], [0, 0, 1, 1], [], []>} : vector<16x4xf32>, vector<4x96xf32>, vector<16x96xf32> -> vector<16x96xf32>
    %7 = vector.broadcast %3 : vector<1x96xf32> to vector<16x96xf32>
    %8 = arith.addf %6, %7 : vector<16x96xf32>
    %9 = vector.extract_strided_slice %8 {offsets = [0, 0], sizes = [16, 32], strides = [1, 1]} : vector<16x96xf32> to vector<16x32xf32>
    %10 = vector.extract_strided_slice %8 {offsets = [0, 32], sizes = [16, 32], strides = [1, 1]} : vector<16x96xf32> to vector<16x32xf32>
    %11 = vector.extract_strided_slice %8 {offsets = [0, 64], sizes = [16, 32], strides = [1, 1]} : vector<16x96xf32> to vector<16x32xf32>
    %12 = vector.extract_strided_slice %9 {offsets = [0, 0], sizes = [16, 8], strides = [1, 1]} : vector<16x32xf32> to vector<16x8xf32>
    %13 = vector.shape_cast %12 : vector<16x8xf32> to vector<2x8x8xf32>
    %14 = vector.extract_strided_slice %9 {offsets = [0, 8], sizes = [16, 8], strides = [1, 1]} : vector<16x32xf32> to vector<16x8xf32>
    %15 = vector.shape_cast %14 : vector<16x8xf32> to vector<2x8x8xf32>
    %16 = vector.extract_strided_slice %9 {offsets = [0, 16], sizes = [16, 8], strides = [1, 1]} : vector<16x32xf32> to vector<16x8xf32>
    %17 = vector.shape_cast %16 : vector<16x8xf32> to vector<2x8x8xf32>
    %18 = vector.extract_strided_slice %9 {offsets = [0, 24], sizes = [16, 8], strides = [1, 1]} : vector<16x32xf32> to vector<16x8xf32>
    %19 = vector.shape_cast %18 : vector<16x8xf32> to vector<2x8x8xf32>
    %20 = tpu.concatenate %13, %15, %17, %19 in 0 : vector<2x8x8xf32>, vector<2x8x8xf32>, vector<2x8x8xf32>, vector<2x8x8xf32> -> vector<8x8x8xf32>
    %21 = vector.extract_strided_slice %10 {offsets = [0, 0], sizes = [16, 8], strides = [1, 1]} : vector<16x32xf32> to vector<16x8xf32>
    %22 = vector.shape_cast %21 : vector<16x8xf32> to vector<2x8x8xf32>
    %23 = vector.extract_strided_slice %10 {offsets = [0, 8], sizes = [16, 8], strides = [1, 1]} : vector<16x32xf32> to vector<16x8xf32>
    %24 = vector.shape_cast %23 : vector<16x8xf32> to vector<2x8x8xf32>
    %25 = vector.extract_strided_slice %10 {offsets = [0, 16], sizes = [16, 8], strides = [1, 1]} : vector<16x32xf32> to vector<16x8xf32>
    %26 = vector.shape_cast %25 : vector<16x8xf32> to vector<2x8x8xf32>
    %27 = vector.extract_strided_slice %10 {offsets = [0, 24], sizes = [16, 8], strides = [1, 1]} : vector<16x32xf32> to vector<16x8xf32>
    %28 = vector.shape_cast %27 : vector<16x8xf32> to vector<2x8x8xf32>
    %29 = tpu.concatenate %22, %24, %26, %28 in 0 : vector<2x8x8xf32>, vector<2x8x8xf32>, vector<2x8x8xf32>, vector<2x8x8xf32> -> vector<8x8x8xf32>
    %30 = vector.extract_strided_slice %11 {offsets = [0, 0], sizes = [16, 8], strides = [1, 1]} : vector<16x32xf32> to vector<16x8xf32>
    %31 = vector.shape_cast %30 : vector<16x8xf32> to vector<2x8x8xf32>
    %32 = vector.extract_strided_slice %11 {offsets = [0, 8], sizes = [16, 8], strides = [1, 1]} : vector<16x32xf32> to vector<16x8xf32>
    %33 = vector.shape_cast %32 : vector<16x8xf32> to vector<2x8x8xf32>
    %34 = vector.extract_strided_slice %11 {offsets = [0, 16], sizes = [16, 8], strides = [1, 1]} : vector<16x32xf32> to vector<16x8xf32>
    %35 = vector.shape_cast %34 : vector<16x8xf32> to vector<2x8x8xf32>
    %36 = vector.extract_strided_slice %11 {offsets = [0, 24], sizes = [16, 8], strides = [1, 1]} : vector<16x32xf32> to vector<16x8xf32>
    %37 = vector.shape_cast %36 : vector<16x8xf32> to vector<2x8x8xf32>
    %38 = tpu.concatenate %31, %33, %35, %37 in 0 : vector<2x8x8xf32>, vector<2x8x8xf32>, vector<2x8x8xf32>, vector<2x8x8xf32> -> vector<8x8x8xf32>
    "tpu.trace_start"() <{level = 10 : i32, message = "bqd,bkd->bqk"}> : () -> ()
    %cst_7 = arith.constant dense<0.000000e+00> : vector<8x8x8xf32>
    %39 = tpu.matmul %20, %29, %cst_7 {dimension_numbers = #tpu.dot_dimension_numbers<[2], [2], [1], [1], [0, 0, 0, 1, 1, 1], [0], [0]>} : vector<8x8x8xf32>, vector<8x8x8xf32>, vector<8x8x8xf32> -> vector<8x8x8xf32>
    "tpu.trace_stop"() : () -> ()
    %cst_8 = arith.constant 0.176776692 : f32
    %40 = vector.broadcast %cst_8 : f32 to vector<8x8x8xf32>
    %41 = arith.mulf %39, %40 : vector<8x8x8xf32>
    %cst_9 = arith.constant dense<0xFF800000> : vector<8x8xf32>
    %42 = vector.multi_reduction <maximumf>, %41, %cst_9 [2] : vector<8x8x8xf32> to vector<8x8xf32>
    %43 = vector.shape_cast %42 : vector<8x8xf32> to vector<8x8x1xf32>
    %44 = vector.broadcast %43 : vector<8x8x1xf32> to vector<8x8x8xf32>
    %45 = arith.subf %41, %44 : vector<8x8x8xf32>
    %46 = math.exp %45 : vector<8x8x8xf32>
    %cst_10 = arith.constant dense<0.000000e+00> : vector<8x8xf32>
    %47 = vector.multi_reduction <add>, %46, %cst_10 [2] : vector<8x8x8xf32> to vector<8x8xf32>
    %48 = vector.shape_cast %47 : vector<8x8xf32> to vector<8x8x1xf32>
    %49 = tpu.reciprocal %48 {approx = true} : vector<8x8x1xf32> -> vector<8x8x1xf32>
    %50 = vector.broadcast %49 : vector<8x8x1xf32> to vector<8x8x8xf32>
    %51 = arith.mulf %46, %50 : vector<8x8x8xf32>
    "tpu.trace_start"() <{level = 10 : i32, message = "bqk,bkd->bqd"}> : () -> ()
    %cst_11 = arith.constant dense<0.000000e+00> : vector<8x8x8xf32>
    %52 = tpu.matmul %51, %38, %cst_11 {dimension_numbers = #tpu.dot_dimension_numbers<[2], [1], [1], [2], [0, 0, 0, 1, 1, 2], [0], [0]>} : vector<8x8x8xf32>, vector<8x8x8xf32>, vector<8x8x8xf32> -> vector<8x8x8xf32>
    "tpu.trace_stop"() : () -> ()
    %53 = vector.extract_strided_slice %52 {offsets = [0, 0, 0], sizes = [2, 8, 8], strides = [1, 1, 1]} : vector<8x8x8xf32> to vector<2x8x8xf32>
    %54 = vector.extract_strided_slice %52 {offsets = [2, 0, 0], sizes = [2, 8, 8], strides = [1, 1, 1]} : vector<8x8x8xf32> to vector<2x8x8xf32>
    %55 = vector.extract_strided_slice %52 {offsets = [4, 0, 0], sizes = [2, 8, 8], strides = [1, 1, 1]} : vector<8x8x8xf32> to vector<2x8x8xf32>
    %56 = vector.extract_strided_slice %52 {offsets = [6, 0, 0], sizes = [2, 8, 8], strides = [1, 1, 1]} : vector<8x8x8xf32> to vector<2x8x8xf32>
    %57 = tpu.concatenate %53, %54, %55, %56 in 2 : vector<2x8x8xf32>, vector<2x8x8xf32>, vector<2x8x8xf32>, vector<2x8x8xf32> -> vector<2x8x32xf32>
    %58 = vector.shape_cast %57 : vector<2x8x32xf32> to vector<16x32xf32>
    %59 = arith.addf %9, %58 : vector<16x32xf32>
    %cst_12 = arith.constant dense<0.000000e+00> : vector<16x32xf32>
    %60 = tpu.matmul %59, %4, %cst_12 {dimension_numbers = #tpu.dot_dimension_numbers<[1], [0], [0], [1], [0, 0, 1, 1], [], []>} : vector<16x32xf32>, vector<32x32xf32>, vector<16x32xf32> -> vector<16x32xf32>
    %61 = vector.broadcast %5 : vector<1x32xf32> to vector<16x32xf32>
    %62 = arith.addf %60, %61 : vector<16x32xf32>
    %63 = arith.negf %62 : vector<16x32xf32>
    %64 = math.exp %63 : vector<16x32xf32>
    %cst_13 = arith.constant 1.000000e+00 : f32
    %65 = vector.broadcast %cst_13 : f32 to vector<16x32xf32>
    %66 = arith.addf %65, %64 : vector<16x32xf32>
    %67 = arith.divf %65, %66 : vector<16x32xf32>
    %68 = arith.mulf %62, %67 : vector<16x32xf32>
    %69 = arith.addf %59, %68 : vector<16x32xf32>
    %c0_14 = arith.constant 0 : index
    %c0_15 = arith.constant 0 : index
    %70 = vector.load %arg3[%c0_14, %c0_15] : memref<80x96xf32, #tpu.memory_space<vmem>>, vector<32x96xf32>
    %c32 = arith.constant 32 : index
    %c0_16 = arith.constant 0 : index
    %71 = vector.load %arg3[%c32, %c0_16] : memref<80x96xf32, #tpu.memory_space<vmem>>, vector<1x96xf32>
    %c40_17 = arith.constant 40 : index
    %c0_18 = arith.constant 0 : index
    %72 = vector.load %arg3[%c40_17, %c0_18] : memref<80x96xf32, #tpu.memory_space<vmem>>, vector<32x32xf32>
    %c72 = arith.constant 72 : index
    %c0_19 = arith.constant 0 : index
    %73 = vector.load %arg3[%c72, %c0_19] : memref<80x96xf32, #tpu.memory_space<vmem>>, vector<1x32xf32>
    %cst_20 = arith.constant dense<0.000000e+00> : vector<16x96xf32>
    %74 = tpu.matmul %69, %70, %cst_20 {dimension_numbers = #tpu.dot_dimension_numbers<[1], [0], [0], [1], [0, 0, 1, 1], [], []>} : vector<16x32xf32>, vector<32x96xf32>, vector<16x96xf32> -> vector<16x96xf32>
    %75 = vector.broadcast %71 : vector<1x96xf32> to vector<16x96xf32>
    %76 = arith.addf %74, %75 : vector<16x96xf32>
    %77 = vector.extract_strided_slice %76 {offsets = [0, 0], sizes = [16, 32], strides = [1, 1]} : vector<16x96xf32> to vector<16x32xf32>
    %78 = vector.extract_strided_slice %76 {offsets = [0, 32], sizes = [16, 32], strides = [1, 1]} : vector<16x96xf32> to vector<16x32xf32>
    %79 = vector.extract_strided_slice %76 {offsets = [0, 64], sizes = [16, 32], strides = [1, 1]} : vector<16x96xf32> to vector<16x32xf32>
    %80 = vector.extract_strided_slice %77 {offsets = [0, 0], sizes = [16, 8], strides = [1, 1]} : vector<16x32xf32> to vector<16x8xf32>
    %81 = vector.shape_cast %80 : vector<16x8xf32> to vector<2x8x8xf32>
    %82 = vector.extract_strided_slice %77 {offsets = [0, 8], sizes = [16, 8], strides = [1, 1]} : vector<16x32xf32> to vector<16x8xf32>
    %83 = vector.shape_cast %82 : vector<16x8xf32> to vector<2x8x8xf32>
    %84 = vector.extract_strided_slice %77 {offsets = [0, 16], sizes = [16, 8], strides = [1, 1]} : vector<16x32xf32> to vector<16x8xf32>
    %85 = vector.shape_cast %84 : vector<16x8xf32> to vector<2x8x8xf32>
    %86 = vector.extract_strided_slice %77 {offsets = [0, 24], sizes = [16, 8], strides = [1, 1]} : vector<16x32xf32> to vector<16x8xf32>
    %87 = vector.shape_cast %86 : vector<16x8xf32> to vector<2x8x8xf32>
    %88 = tpu.concatenate %81, %83, %85, %87 in 0 : vector<2x8x8xf32>, vector<2x8x8xf32>, vector<2x8x8xf32>, vector<2x8x8xf32> -> vector<8x8x8xf32>
    %89 = vector.extract_strided_slice %78 {offsets = [0, 0], sizes = [16, 8], strides = [1, 1]} : vector<16x32xf32> to vector<16x8xf32>
    %90 = vector.shape_cast %89 : vector<16x8xf32> to vector<2x8x8xf32>
    %91 = vector.extract_strided_slice %78 {offsets = [0, 8], sizes = [16, 8], strides = [1, 1]} : vector<16x32xf32> to vector<16x8xf32>
    %92 = vector.shape_cast %91 : vector<16x8xf32> to vector<2x8x8xf32>
    %93 = vector.extract_strided_slice %78 {offsets = [0, 16], sizes = [16, 8], strides = [1, 1]} : vector<16x32xf32> to vector<16x8xf32>
    %94 = vector.shape_cast %93 : vector<16x8xf32> to vector<2x8x8xf32>
    %95 = vector.extract_strided_slice %78 {offsets = [0, 24], sizes = [16, 8], strides = [1, 1]} : vector<16x32xf32> to vector<16x8xf32>
    %96 = vector.shape_cast %95 : vector<16x8xf32> to vector<2x8x8xf32>
    %97 = tpu.concatenate %90, %92, %94, %96 in 0 : vector<2x8x8xf32>, vector<2x8x8xf32>, vector<2x8x8xf32>, vector<2x8x8xf32> -> vector<8x8x8xf32>
    %98 = vector.extract_strided_slice %79 {offsets = [0, 0], sizes = [16, 8], strides = [1, 1]} : vector<16x32xf32> to vector<16x8xf32>
    %99 = vector.shape_cast %98 : vector<16x8xf32> to vector<2x8x8xf32>
    %100 = vector.extract_strided_slice %79 {offsets = [0, 8], sizes = [16, 8], strides = [1, 1]} : vector<16x32xf32> to vector<16x8xf32>
    %101 = vector.shape_cast %100 : vector<16x8xf32> to vector<2x8x8xf32>
    %102 = vector.extract_strided_slice %79 {offsets = [0, 16], sizes = [16, 8], strides = [1, 1]} : vector<16x32xf32> to vector<16x8xf32>
    %103 = vector.shape_cast %102 : vector<16x8xf32> to vector<2x8x8xf32>
    %104 = vector.extract_strided_slice %79 {offsets = [0, 24], sizes = [16, 8], strides = [1, 1]} : vector<16x32xf32> to vector<16x8xf32>
    %105 = vector.shape_cast %104 : vector<16x8xf32> to vector<2x8x8xf32>
    %106 = tpu.concatenate %99, %101, %103, %105 in 0 : vector<2x8x8xf32>, vector<2x8x8xf32>, vector<2x8x8xf32>, vector<2x8x8xf32> -> vector<8x8x8xf32>
    "tpu.trace_start"() <{level = 10 : i32, message = "bqd,bkd->bqk"}> : () -> ()
    %cst_21 = arith.constant dense<0.000000e+00> : vector<8x8x8xf32>
    %107 = tpu.matmul %88, %97, %cst_21 {dimension_numbers = #tpu.dot_dimension_numbers<[2], [2], [1], [1], [0, 0, 0, 1, 1, 1], [0], [0]>} : vector<8x8x8xf32>, vector<8x8x8xf32>, vector<8x8x8xf32> -> vector<8x8x8xf32>
    "tpu.trace_stop"() : () -> ()
    %cst_22 = arith.constant 0.176776692 : f32
    %108 = vector.broadcast %cst_22 : f32 to vector<8x8x8xf32>
    %109 = arith.mulf %107, %108 : vector<8x8x8xf32>
    %cst_23 = arith.constant dense<0xFF800000> : vector<8x8xf32>
    %110 = vector.multi_reduction <maximumf>, %109, %cst_23 [2] : vector<8x8x8xf32> to vector<8x8xf32>
    %111 = vector.shape_cast %110 : vector<8x8xf32> to vector<8x8x1xf32>
    %112 = vector.broadcast %111 : vector<8x8x1xf32> to vector<8x8x8xf32>
    %113 = arith.subf %109, %112 : vector<8x8x8xf32>
    %114 = math.exp %113 : vector<8x8x8xf32>
    %cst_24 = arith.constant dense<0.000000e+00> : vector<8x8xf32>
    %115 = vector.multi_reduction <add>, %114, %cst_24 [2] : vector<8x8x8xf32> to vector<8x8xf32>
    %116 = vector.shape_cast %115 : vector<8x8xf32> to vector<8x8x1xf32>
    %117 = tpu.reciprocal %116 {approx = true} : vector<8x8x1xf32> -> vector<8x8x1xf32>
    %118 = vector.broadcast %117 : vector<8x8x1xf32> to vector<8x8x8xf32>
    %119 = arith.mulf %114, %118 : vector<8x8x8xf32>
    "tpu.trace_start"() <{level = 10 : i32, message = "bqk,bkd->bqd"}> : () -> ()
    %cst_25 = arith.constant dense<0.000000e+00> : vector<8x8x8xf32>
    %120 = tpu.matmul %119, %106, %cst_25 {dimension_numbers = #tpu.dot_dimension_numbers<[2], [1], [1], [2], [0, 0, 0, 1, 1, 2], [0], [0]>} : vector<8x8x8xf32>, vector<8x8x8xf32>, vector<8x8x8xf32> -> vector<8x8x8xf32>
    "tpu.trace_stop"() : () -> ()
    %121 = vector.extract_strided_slice %120 {offsets = [0, 0, 0], sizes = [2, 8, 8], strides = [1, 1, 1]} : vector<8x8x8xf32> to vector<2x8x8xf32>
    %122 = vector.extract_strided_slice %120 {offsets = [2, 0, 0], sizes = [2, 8, 8], strides = [1, 1, 1]} : vector<8x8x8xf32> to vector<2x8x8xf32>
    %123 = vector.extract_strided_slice %120 {offsets = [4, 0, 0], sizes = [2, 8, 8], strides = [1, 1, 1]} : vector<8x8x8xf32> to vector<2x8x8xf32>
    %124 = vector.extract_strided_slice %120 {offsets = [6, 0, 0], sizes = [2, 8, 8], strides = [1, 1, 1]} : vector<8x8x8xf32> to vector<2x8x8xf32>
    %125 = tpu.concatenate %121, %122, %123, %124 in 2 : vector<2x8x8xf32>, vector<2x8x8xf32>, vector<2x8x8xf32>, vector<2x8x8xf32> -> vector<2x8x32xf32>
    %126 = vector.shape_cast %125 : vector<2x8x32xf32> to vector<16x32xf32>
    %127 = arith.addf %77, %126 : vector<16x32xf32>
    %cst_26 = arith.constant dense<0.000000e+00> : vector<16x32xf32>
    %128 = tpu.matmul %127, %72, %cst_26 {dimension_numbers = #tpu.dot_dimension_numbers<[1], [0], [0], [1], [0, 0, 1, 1], [], []>} : vector<16x32xf32>, vector<32x32xf32>, vector<16x32xf32> -> vector<16x32xf32>
    %129 = vector.broadcast %73 : vector<1x32xf32> to vector<16x32xf32>
    %130 = arith.addf %128, %129 : vector<16x32xf32>
    %131 = arith.negf %130 : vector<16x32xf32>
    %132 = math.exp %131 : vector<16x32xf32>
    %cst_27 = arith.constant 1.000000e+00 : f32
    %133 = vector.broadcast %cst_27 : f32 to vector<16x32xf32>
    %134 = arith.addf %133, %132 : vector<16x32xf32>
    %135 = arith.divf %133, %134 : vector<16x32xf32>
    %136 = arith.mulf %130, %135 : vector<16x32xf32>
    %137 = arith.addf %127, %136 : vector<16x32xf32>
    %c80 = arith.constant 80 : index
    %c0_28 = arith.constant 0 : index
    %138 = vector.load %arg4[%c80, %c0_28] : memref<88x96xf32, #tpu.memory_space<vmem>>, vector<1x32xf32>
    %139 = vector.shape_cast %138 : vector<1x32xf32> to vector<1x32xf32>
    %140 = vector.broadcast %139 : vector<1x32xf32> to vector<2x32xf32>
    %c0_29 = arith.constant 0 : index
    %c0_30 = arith.constant 0 : index
    %141 = vector.load %arg4[%c0_29, %c0_30] : memref<88x96xf32, #tpu.memory_space<vmem>>, vector<32x96xf32>
    %c32_31 = arith.constant 32 : index
    %c0_32 = arith.constant 0 : index
    %142 = vector.load %arg4[%c32_31, %c0_32] : memref<88x96xf32, #tpu.memory_space<vmem>>, vector<1x96xf32>
    %c40_33 = arith.constant 40 : index
    %c0_34 = arith.constant 0 : index
    %143 = vector.load %arg4[%c40_33, %c0_34] : memref<88x96xf32, #tpu.memory_space<vmem>>, vector<32x32xf32>
    %c72_35 = arith.constant 72 : index
    %c0_36 = arith.constant 0 : index
    %144 = vector.load %arg4[%c72_35, %c0_36] : memref<88x96xf32, #tpu.memory_space<vmem>>, vector<1x32xf32>
    %145 = vector.extract_strided_slice %141 {offsets = [0, 0], sizes = [32, 32], strides = [1, 1]} : vector<32x96xf32> to vector<32x32xf32>
    %cst_37 = arith.constant dense<0.000000e+00> : vector<2x32xf32>
    %146 = tpu.matmul %140, %145, %cst_37 {dimension_numbers = #tpu.dot_dimension_numbers<[1], [0], [0], [1], [0, 0, 1, 1], [], []>} : vector<2x32xf32>, vector<32x32xf32>, vector<2x32xf32> -> vector<2x32xf32>
    %147 = vector.extract_strided_slice %142 {offsets = [0, 0], sizes = [1, 32], strides = [1, 1]} : vector<1x96xf32> to vector<1x32xf32>
    %148 = vector.broadcast %147 : vector<1x32xf32> to vector<2x32xf32>
    %149 = arith.addf %146, %148 : vector<2x32xf32>
    %150 = vector.extract_strided_slice %141 {offsets = [0, 32], sizes = [32, 64], strides = [1, 1]} : vector<32x96xf32> to vector<32x64xf32>
    %cst_38 = arith.constant dense<0.000000e+00> : vector<16x64xf32>
    %151 = tpu.matmul %137, %150, %cst_38 {dimension_numbers = #tpu.dot_dimension_numbers<[1], [0], [0], [1], [0, 0, 1, 1], [], []>} : vector<16x32xf32>, vector<32x64xf32>, vector<16x64xf32> -> vector<16x64xf32>
    %152 = vector.extract_strided_slice %142 {offsets = [0, 32], sizes = [1, 64], strides = [1, 1]} : vector<1x96xf32> to vector<1x64xf32>
    %153 = vector.broadcast %152 : vector<1x64xf32> to vector<16x64xf32>
    %154 = arith.addf %151, %153 : vector<16x64xf32>
    %155 = vector.extract_strided_slice %154 {offsets = [0, 0], sizes = [16, 32], strides = [1, 1]} : vector<16x64xf32> to vector<16x32xf32>
    %156 = vector.extract_strided_slice %154 {offsets = [0, 32], sizes = [16, 32], strides = [1, 1]} : vector<16x64xf32> to vector<16x32xf32>
    %157 = vector.extract_strided_slice %149 {offsets = [0, 0], sizes = [2, 8], strides = [1, 1]} : vector<2x32xf32> to vector<2x8xf32>
    %158 = vector.shape_cast %157 : vector<2x8xf32> to vector<2x1x8xf32>
    %159 = vector.extract_strided_slice %149 {offsets = [0, 8], sizes = [2, 8], strides = [1, 1]} : vector<2x32xf32> to vector<2x8xf32>
    %160 = vector.shape_cast %159 : vector<2x8xf32> to vector<2x1x8xf32>
    %161 = vector.extract_strided_slice %149 {offsets = [0, 16], sizes = [2, 8], strides = [1, 1]} : vector<2x32xf32> to vector<2x8xf32>
    %162 = vector.shape_cast %161 : vector<2x8xf32> to vector<2x1x8xf32>
    %163 = vector.extract_strided_slice %149 {offsets = [0, 24], sizes = [2, 8], strides = [1, 1]} : vector<2x32xf32> to vector<2x8xf32>
    %164 = vector.shape_cast %163 : vector<2x8xf32> to vector<2x1x8xf32>
    %165 = tpu.concatenate %158, %160, %162, %164 in 0 : vector<2x1x8xf32>, vector<2x1x8xf32>, vector<2x1x8xf32>, vector<2x1x8xf32> -> vector<8x1x8xf32>
    %166 = vector.extract_strided_slice %155 {offsets = [0, 0], sizes = [16, 8], strides = [1, 1]} : vector<16x32xf32> to vector<16x8xf32>
    %167 = vector.shape_cast %166 : vector<16x8xf32> to vector<2x8x8xf32>
    %168 = vector.extract_strided_slice %155 {offsets = [0, 8], sizes = [16, 8], strides = [1, 1]} : vector<16x32xf32> to vector<16x8xf32>
    %169 = vector.shape_cast %168 : vector<16x8xf32> to vector<2x8x8xf32>
    %170 = vector.extract_strided_slice %155 {offsets = [0, 16], sizes = [16, 8], strides = [1, 1]} : vector<16x32xf32> to vector<16x8xf32>
    %171 = vector.shape_cast %170 : vector<16x8xf32> to vector<2x8x8xf32>
    %172 = vector.extract_strided_slice %155 {offsets = [0, 24], sizes = [16, 8], strides = [1, 1]} : vector<16x32xf32> to vector<16x8xf32>
    %173 = vector.shape_cast %172 : vector<16x8xf32> to vector<2x8x8xf32>
    %174 = tpu.concatenate %167, %169, %171, %173 in 0 : vector<2x8x8xf32>, vector<2x8x8xf32>, vector<2x8x8xf32>, vector<2x8x8xf32> -> vector<8x8x8xf32>
    %175 = vector.extract_strided_slice %156 {offsets = [0, 0], sizes = [16, 8], strides = [1, 1]} : vector<16x32xf32> to vector<16x8xf32>
    %176 = vector.shape_cast %175 : vector<16x8xf32> to vector<2x8x8xf32>
    %177 = vector.extract_strided_slice %156 {offsets = [0, 8], sizes = [16, 8], strides = [1, 1]} : vector<16x32xf32> to vector<16x8xf32>
    %178 = vector.shape_cast %177 : vector<16x8xf32> to vector<2x8x8xf32>
    %179 = vector.extract_strided_slice %156 {offsets = [0, 16], sizes = [16, 8], strides = [1, 1]} : vector<16x32xf32> to vector<16x8xf32>
    %180 = vector.shape_cast %179 : vector<16x8xf32> to vector<2x8x8xf32>
    %181 = vector.extract_strided_slice %156 {offsets = [0, 24], sizes = [16, 8], strides = [1, 1]} : vector<16x32xf32> to vector<16x8xf32>
    %182 = vector.shape_cast %181 : vector<16x8xf32> to vector<2x8x8xf32>
    %183 = tpu.concatenate %176, %178, %180, %182 in 0 : vector<2x8x8xf32>, vector<2x8x8xf32>, vector<2x8x8xf32>, vector<2x8x8xf32> -> vector<8x8x8xf32>
    "tpu.trace_start"() <{level = 10 : i32, message = "bqd,bkd->bqk"}> : () -> ()
    %cst_39 = arith.constant dense<0.000000e+00> : vector<8x1x8xf32>
    %184 = tpu.matmul %165, %174, %cst_39 {dimension_numbers = #tpu.dot_dimension_numbers<[2], [2], [1], [1], [0, 0, 0, 1, 1, 1], [0], [0]>} : vector<8x1x8xf32>, vector<8x8x8xf32>, vector<8x1x8xf32> -> vector<8x1x8xf32>
    "tpu.trace_stop"() : () -> ()
    %cst_40 = arith.constant 0.176776692 : f32
    %185 = vector.broadcast %cst_40 : f32 to vector<8x1x8xf32>
    %186 = arith.mulf %184, %185 : vector<8x1x8xf32>
    %cst_41 = arith.constant dense<0xFF800000> : vector<8x1xf32>
    %187 = vector.multi_reduction <maximumf>, %186, %cst_41 [2] : vector<8x1x8xf32> to vector<8x1xf32>
    %188 = vector.shape_cast %187 : vector<8x1xf32> to vector<8x1x1xf32>
    %189 = vector.broadcast %188 : vector<8x1x1xf32> to vector<8x1x8xf32>
    %190 = arith.subf %186, %189 : vector<8x1x8xf32>
    %191 = math.exp %190 : vector<8x1x8xf32>
    %cst_42 = arith.constant dense<0.000000e+00> : vector<8x1xf32>
    %192 = vector.multi_reduction <add>, %191, %cst_42 [2] : vector<8x1x8xf32> to vector<8x1xf32>
    %193 = vector.shape_cast %192 : vector<8x1xf32> to vector<8x1x1xf32>
    %194 = tpu.reciprocal %193 {approx = true} : vector<8x1x1xf32> -> vector<8x1x1xf32>
    %195 = vector.broadcast %194 : vector<8x1x1xf32> to vector<8x1x8xf32>
    %196 = arith.mulf %191, %195 : vector<8x1x8xf32>
    "tpu.trace_start"() <{level = 10 : i32, message = "bqk,bkd->bqd"}> : () -> ()
    %cst_43 = arith.constant dense<0.000000e+00> : vector<8x1x8xf32>
    %197 = tpu.matmul %196, %183, %cst_43 {dimension_numbers = #tpu.dot_dimension_numbers<[2], [1], [1], [2], [0, 0, 0, 1, 1, 2], [0], [0]>} : vector<8x1x8xf32>, vector<8x8x8xf32>, vector<8x1x8xf32> -> vector<8x1x8xf32>
    "tpu.trace_stop"() : () -> ()
    %198 = vector.extract_strided_slice %197 {offsets = [0, 0, 0], sizes = [2, 1, 8], strides = [1, 1, 1]} : vector<8x1x8xf32> to vector<2x1x8xf32>
    %199 = vector.extract_strided_slice %197 {offsets = [2, 0, 0], sizes = [2, 1, 8], strides = [1, 1, 1]} : vector<8x1x8xf32> to vector<2x1x8xf32>
    %200 = vector.extract_strided_slice %197 {offsets = [4, 0, 0], sizes = [2, 1, 8], strides = [1, 1, 1]} : vector<8x1x8xf32> to vector<2x1x8xf32>
    %201 = vector.extract_strided_slice %197 {offsets = [6, 0, 0], sizes = [2, 1, 8], strides = [1, 1, 1]} : vector<8x1x8xf32> to vector<2x1x8xf32>
    %202 = tpu.concatenate %198, %199, %200, %201 in 2 : vector<2x1x8xf32>, vector<2x1x8xf32>, vector<2x1x8xf32>, vector<2x1x8xf32> -> vector<2x1x32xf32>
    %203 = vector.shape_cast %202 : vector<2x1x32xf32> to vector<2x32xf32>
    %204 = arith.addf %149, %203 : vector<2x32xf32>
    %cst_44 = arith.constant dense<0.000000e+00> : vector<2x32xf32>
    %205 = tpu.matmul %204, %143, %cst_44 {dimension_numbers = #tpu.dot_dimension_numbers<[1], [0], [0], [1], [0, 0, 1, 1], [], []>} : vector<2x32xf32>, vector<32x32xf32>, vector<2x32xf32> -> vector<2x32xf32>
    %206 = vector.broadcast %144 : vector<1x32xf32> to vector<2x32xf32>
    %207 = arith.addf %205, %206 : vector<2x32xf32>
    %208 = arith.negf %207 : vector<2x32xf32>
    %209 = math.exp %208 : vector<2x32xf32>
    %cst_45 = arith.constant 1.000000e+00 : f32
    %210 = vector.broadcast %cst_45 : f32 to vector<2x32xf32>
    %211 = arith.addf %210, %209 : vector<2x32xf32>
    %212 = arith.divf %210, %211 : vector<2x32xf32>
    %213 = arith.mulf %207, %212 : vector<2x32xf32>
    %214 = arith.addf %204, %213 : vector<2x32xf32>
    %c0_46 = arith.constant 0 : index
    %c0_47 = arith.constant 0 : index
    %215 = vector.load %arg5[%c0_46, %c0_47] : memref<80x96xf32, #tpu.memory_space<vmem>>, vector<32x96xf32>
    %c32_48 = arith.constant 32 : index
    %c0_49 = arith.constant 0 : index
    %216 = vector.load %arg5[%c32_48, %c0_49] : memref<80x96xf32, #tpu.memory_space<vmem>>, vector<1x96xf32>
    %c40_50 = arith.constant 40 : index
    %c0_51 = arith.constant 0 : index
    %217 = vector.load %arg5[%c40_50, %c0_51] : memref<80x96xf32, #tpu.memory_space<vmem>>, vector<32x32xf32>
    %c72_52 = arith.constant 72 : index
    %c0_53 = arith.constant 0 : index
    %218 = vector.load %arg5[%c72_52, %c0_53] : memref<80x96xf32, #tpu.memory_space<vmem>>, vector<1x32xf32>
    %cst_54 = arith.constant dense<0.000000e+00> : vector<2x96xf32>
    %219 = tpu.matmul %214, %215, %cst_54 {dimension_numbers = #tpu.dot_dimension_numbers<[1], [0], [0], [1], [0, 0, 1, 1], [], []>} : vector<2x32xf32>, vector<32x96xf32>, vector<2x96xf32> -> vector<2x96xf32>
    %220 = vector.broadcast %216 : vector<1x96xf32> to vector<2x96xf32>
    %221 = arith.addf %219, %220 : vector<2x96xf32>
    %222 = vector.extract_strided_slice %221 {offsets = [0, 0], sizes = [2, 32], strides = [1, 1]} : vector<2x96xf32> to vector<2x32xf32>
    %223 = vector.extract_strided_slice %221 {offsets = [0, 32], sizes = [2, 32], strides = [1, 1]} : vector<2x96xf32> to vector<2x32xf32>
    %224 = vector.extract_strided_slice %221 {offsets = [0, 64], sizes = [2, 32], strides = [1, 1]} : vector<2x96xf32> to vector<2x32xf32>
    %225 = vector.extract_strided_slice %222 {offsets = [0, 0], sizes = [2, 8], strides = [1, 1]} : vector<2x32xf32> to vector<2x8xf32>
    %226 = vector.shape_cast %225 : vector<2x8xf32> to vector<2x1x8xf32>
    %227 = vector.extract_strided_slice %222 {offsets = [0, 8], sizes = [2, 8], strides = [1, 1]} : vector<2x32xf32> to vector<2x8xf32>
    %228 = vector.shape_cast %227 : vector<2x8xf32> to vector<2x1x8xf32>
    %229 = vector.extract_strided_slice %222 {offsets = [0, 16], sizes = [2, 8], strides = [1, 1]} : vector<2x32xf32> to vector<2x8xf32>
    %230 = vector.shape_cast %229 : vector<2x8xf32> to vector<2x1x8xf32>
    %231 = vector.extract_strided_slice %222 {offsets = [0, 24], sizes = [2, 8], strides = [1, 1]} : vector<2x32xf32> to vector<2x8xf32>
    %232 = vector.shape_cast %231 : vector<2x8xf32> to vector<2x1x8xf32>
    %233 = tpu.concatenate %226, %228, %230, %232 in 0 : vector<2x1x8xf32>, vector<2x1x8xf32>, vector<2x1x8xf32>, vector<2x1x8xf32> -> vector<8x1x8xf32>
    %234 = vector.extract_strided_slice %223 {offsets = [0, 0], sizes = [2, 8], strides = [1, 1]} : vector<2x32xf32> to vector<2x8xf32>
    %235 = vector.shape_cast %234 : vector<2x8xf32> to vector<2x1x8xf32>
    %236 = vector.extract_strided_slice %223 {offsets = [0, 8], sizes = [2, 8], strides = [1, 1]} : vector<2x32xf32> to vector<2x8xf32>
    %237 = vector.shape_cast %236 : vector<2x8xf32> to vector<2x1x8xf32>
    %238 = vector.extract_strided_slice %223 {offsets = [0, 16], sizes = [2, 8], strides = [1, 1]} : vector<2x32xf32> to vector<2x8xf32>
    %239 = vector.shape_cast %238 : vector<2x8xf32> to vector<2x1x8xf32>
    %240 = vector.extract_strided_slice %223 {offsets = [0, 24], sizes = [2, 8], strides = [1, 1]} : vector<2x32xf32> to vector<2x8xf32>
    %241 = vector.shape_cast %240 : vector<2x8xf32> to vector<2x1x8xf32>
    %242 = tpu.concatenate %235, %237, %239, %241 in 0 : vector<2x1x8xf32>, vector<2x1x8xf32>, vector<2x1x8xf32>, vector<2x1x8xf32> -> vector<8x1x8xf32>
    %243 = vector.extract_strided_slice %224 {offsets = [0, 0], sizes = [2, 8], strides = [1, 1]} : vector<2x32xf32> to vector<2x8xf32>
    %244 = vector.shape_cast %243 : vector<2x8xf32> to vector<2x1x8xf32>
    %245 = vector.extract_strided_slice %224 {offsets = [0, 8], sizes = [2, 8], strides = [1, 1]} : vector<2x32xf32> to vector<2x8xf32>
    %246 = vector.shape_cast %245 : vector<2x8xf32> to vector<2x1x8xf32>
    %247 = vector.extract_strided_slice %224 {offsets = [0, 16], sizes = [2, 8], strides = [1, 1]} : vector<2x32xf32> to vector<2x8xf32>
    %248 = vector.shape_cast %247 : vector<2x8xf32> to vector<2x1x8xf32>
    %249 = vector.extract_strided_slice %224 {offsets = [0, 24], sizes = [2, 8], strides = [1, 1]} : vector<2x32xf32> to vector<2x8xf32>
    %250 = vector.shape_cast %249 : vector<2x8xf32> to vector<2x1x8xf32>
    %251 = tpu.concatenate %244, %246, %248, %250 in 0 : vector<2x1x8xf32>, vector<2x1x8xf32>, vector<2x1x8xf32>, vector<2x1x8xf32> -> vector<8x1x8xf32>
    "tpu.trace_start"() <{level = 10 : i32, message = "bqd,bkd->bqk"}> : () -> ()
    %cst_55 = arith.constant dense<0.000000e+00> : vector<8x1x1xf32>
    %252 = tpu.matmul %233, %242, %cst_55 {dimension_numbers = #tpu.dot_dimension_numbers<[2], [2], [1], [1], [0, 0, 0, 1, 1, 1], [0], [0]>} : vector<8x1x8xf32>, vector<8x1x8xf32>, vector<8x1x1xf32> -> vector<8x1x1xf32>
    "tpu.trace_stop"() : () -> ()
    %cst_56 = arith.constant 0.176776692 : f32
    %253 = vector.broadcast %cst_56 : f32 to vector<8x1x1xf32>
    %254 = arith.mulf %252, %253 : vector<8x1x1xf32>
    %cst_57 = arith.constant dense<0xFF800000> : vector<8x1xf32>
    %255 = vector.multi_reduction <maximumf>, %254, %cst_57 [2] : vector<8x1x1xf32> to vector<8x1xf32>
    %256 = vector.shape_cast %255 : vector<8x1xf32> to vector<8x1x1xf32>
    %257 = arith.subf %254, %256 : vector<8x1x1xf32>
    %258 = math.exp %257 : vector<8x1x1xf32>
    %cst_58 = arith.constant dense<0.000000e+00> : vector<8x1xf32>
    %259 = vector.multi_reduction <add>, %258, %cst_58 [2] : vector<8x1x1xf32> to vector<8x1xf32>
    %260 = vector.shape_cast %259 : vector<8x1xf32> to vector<8x1x1xf32>
    %261 = tpu.reciprocal %260 {approx = true} : vector<8x1x1xf32> -> vector<8x1x1xf32>
    %262 = arith.mulf %258, %261 : vector<8x1x1xf32>
    "tpu.trace_start"() <{level = 10 : i32, message = "bqk,bkd->bqd"}> : () -> ()
    %cst_59 = arith.constant dense<0.000000e+00> : vector<8x1x8xf32>
    %263 = tpu.matmul %262, %251, %cst_59 {dimension_numbers = #tpu.dot_dimension_numbers<[2], [1], [1], [2], [0, 0, 0, 1, 1, 2], [0], [0]>} : vector<8x1x1xf32>, vector<8x1x8xf32>, vector<8x1x8xf32> -> vector<8x1x8xf32>
    "tpu.trace_stop"() : () -> ()
    %264 = vector.extract_strided_slice %263 {offsets = [0, 0, 0], sizes = [2, 1, 8], strides = [1, 1, 1]} : vector<8x1x8xf32> to vector<2x1x8xf32>
    %265 = vector.extract_strided_slice %263 {offsets = [2, 0, 0], sizes = [2, 1, 8], strides = [1, 1, 1]} : vector<8x1x8xf32> to vector<2x1x8xf32>
    %266 = vector.extract_strided_slice %263 {offsets = [4, 0, 0], sizes = [2, 1, 8], strides = [1, 1, 1]} : vector<8x1x8xf32> to vector<2x1x8xf32>
    %267 = vector.extract_strided_slice %263 {offsets = [6, 0, 0], sizes = [2, 1, 8], strides = [1, 1, 1]} : vector<8x1x8xf32> to vector<2x1x8xf32>
    %268 = tpu.concatenate %264, %265, %266, %267 in 2 : vector<2x1x8xf32>, vector<2x1x8xf32>, vector<2x1x8xf32>, vector<2x1x8xf32> -> vector<2x1x32xf32>
    %269 = vector.shape_cast %268 : vector<2x1x32xf32> to vector<2x32xf32>
    %270 = arith.addf %222, %269 : vector<2x32xf32>
    %cst_60 = arith.constant dense<0.000000e+00> : vector<2x32xf32>
    %271 = tpu.matmul %270, %217, %cst_60 {dimension_numbers = #tpu.dot_dimension_numbers<[1], [0], [0], [1], [0, 0, 1, 1], [], []>} : vector<2x32xf32>, vector<32x32xf32>, vector<2x32xf32> -> vector<2x32xf32>
    %272 = vector.broadcast %218 : vector<1x32xf32> to vector<2x32xf32>
    %273 = arith.addf %271, %272 : vector<2x32xf32>
    %274 = arith.negf %273 : vector<2x32xf32>
    %275 = math.exp %274 : vector<2x32xf32>
    %cst_61 = arith.constant 1.000000e+00 : f32
    %276 = vector.broadcast %cst_61 : f32 to vector<2x32xf32>
    %277 = arith.addf %276, %275 : vector<2x32xf32>
    %278 = arith.divf %276, %277 : vector<2x32xf32>
    %279 = arith.mulf %273, %278 : vector<2x32xf32>
    %280 = arith.addf %270, %279 : vector<2x32xf32>
    %c0_62 = arith.constant 0 : index
    %c0_63 = arith.constant 0 : index
    %281 = vector.load %arg6[%c0_62, %c0_63] : memref<40x4xf32, #tpu.memory_space<vmem>>, vector<32x4xf32>
    %c32_64 = arith.constant 32 : index
    %c0_65 = arith.constant 0 : index
    %282 = vector.load %arg6[%c32_64, %c0_65] : memref<40x4xf32, #tpu.memory_space<vmem>>, vector<1x4xf32>
    %cst_66 = arith.constant dense<0.000000e+00> : vector<2x4xf32>
    %283 = tpu.matmul %280, %281, %cst_66 {dimension_numbers = #tpu.dot_dimension_numbers<[1], [0], [0], [1], [0, 0, 1, 1], [], []>} : vector<2x32xf32>, vector<32x4xf32>, vector<2x4xf32> -> vector<2x4xf32>
    %284 = vector.broadcast %282 : vector<1x4xf32> to vector<2x4xf32>
    %285 = arith.addf %283, %284 : vector<2x4xf32>
    %c0_67 = arith.constant 0 : index
    %c0_68 = arith.constant 0 : index
    %c0_69 = arith.constant 0 : index
    %286 = vector.load %arg7[%c0_67, %c0_68, %c0_69] : memref<2x1x4xf32, #tpu.memory_space<vmem>>, vector<2x1x4xf32>
    %287 = vector.shape_cast %286 : vector<2x1x4xf32> to vector<2x4xf32>
    %288 = vector.shape_cast %285 : vector<2x4xf32> to vector<2x1x4xf32>
    tpu.vector_store %arg7[%c0_67, %c0_68, %c0_69], %288 {strides = array<i32>} : memref<2x1x4xf32, #tpu.memory_space<vmem>>, vector<2x1x4xf32>,
    return
  }
  func.func @transform_0(%arg0: i32) -> (i32, i32, i32) {
    %c0_i32 = arith.constant 0 : i32
    %c0_i32_0 = arith.constant 0 : i32
    %c0_i32_1 = arith.constant 0 : i32
    return %arg0, %c0_i32, %c0_i32_0 : i32, i32, i32
  }
  func.func @transform_1(%arg0: i32) -> (i32, i32) {
    %c0_i32 = arith.constant 0 : i32
    %c0_i32_0 = arith.constant 0 : i32
    %c0_i32_1 = arith.constant 0 : i32
    return %c0_i32, %c0_i32_0 : i32, i32
  }
  func.func @transform_2(%arg0: i32) -> (i32, i32) {
    %c0_i32 = arith.constant 0 : i32
    %c0_i32_0 = arith.constant 0 : i32
    %c0_i32_1 = arith.constant 0 : i32
    return %c0_i32, %c0_i32_0 : i32, i32
  }
  func.func @transform_3(%arg0: i32) -> (i32, i32) {
    %c0_i32 = arith.constant 0 : i32
    %c0_i32_0 = arith.constant 0 : i32
    %c0_i32_1 = arith.constant 0 : i32
    return %c0_i32, %c0_i32_0 : i32, i32
  }
  func.func @transform_4(%arg0: i32) -> (i32, i32) {
    %c0_i32 = arith.constant 0 : i32
    %c0_i32_0 = arith.constant 0 : i32
    %c0_i32_1 = arith.constant 0 : i32
    return %c0_i32, %c0_i32_0 : i32, i32
  }
  func.func @transform_5(%arg0: i32) -> (i32, i32) {
    %c0_i32 = arith.constant 0 : i32
    %c0_i32_0 = arith.constant 0 : i32
    %c0_i32_1 = arith.constant 0 : i32
    return %c0_i32, %c0_i32_0 : i32, i32
  }
  func.func @transform_6(%arg0: i32) -> (i32, i32, i32) {
    %c0_i32 = arith.constant 0 : i32
    %c0_i32_0 = arith.constant 0 : i32
    %c0_i32_1 = arith.constant 0 : i32
    return %arg0, %c0_i32, %c0_i32_0 : i32, i32, i32
  }
}

</mosaic_0001>

<bundles_post_ra>
// kernel: tpu_custom_call.1
= control target key start
LH: loop header
LB: loop body
LE: loop exit
PB: predicated region body
PF: predicated region fallthrough
CT: control target
= control target key end

     0   :  { %11 = vsyncpa [#allocation3], 0  ;;  %s7834_s0 = inlined_call_operand.vmem [shape: f32[2,8,4], index: 0, kind: input, shape index: {}]   ;;  %s7835_s1 = inlined_call_operand.hbm [shape: f32[48,96], index: 1, kind: input, shape index: {}]   ;;  %s7836_s2 = inlined_call_operand.hbm [shape: f32[80,96], index: 2, kind: input, shape index: {}]   ;;  %s7837_s3 = inlined_call_operand.hbm [shape: f32[88,96], index: 3, kind: input, shape index: {}]   ;;  %s7838_s4 = inlined_call_operand.vmem [shape: f32[80,96], index: 4, kind: input, shape index: {}]   ;;  %s7839_s5 = inlined_call_operand.vmem [shape: f32[40,4], index: 5, kind: input, shape index: {}]   ;;  %s7840_s6 = inlined_call_operand.hbm [shape: f32[2,1,4], index: 6, kind: output, shape index: {}]  }
   0x1   :  { %12 = vsyncpa [#allocation6], 0 }
   0x2   :  { %13 = vsyncpa [#allocation4], 0  ;;  %s6987_s21 = smov [#allocation5]   ;;  %s6988_s23 = smov [#allocation2]  }
   0x3   :  { %s33_s22 = sshll.u32 %s6987_s21, 4  ;;  %s21_s24 = sshll.u32 %s6988_s23, 4  ;;  %s34_s22 = int_to_ptr.vmem [resolvable:$true] %s33_s22  ;;  %s7040_s24 = int_to_ptr.vmem [resolvable:$true] %s21_s24 }
   0x4   :  { %s6893_s27 = scalar_lea.hbm %s7836_s2, 1280 }
   0x5   :  { %p6894_p0 = scmp.ne.s32.totalorder %s7836_s2, %s6893_s27  ;;  %p6897_p1 = scmp.lt.u32.totalorder %s6893_s27, %s7836_s2 }
   0x7   :  { %p6899_p2 = pnand %p6897_p1, %p6894_p0 }
   0x9   :  { %6902 = shalt.err (!%p6899_p2)
}
   0xa   :  { %s6903_s8 = scalar_lea.vmem %s34_s22, 1280  ;;  %p6908_p4 = scmp.lt.s32.totalorder %s34_s22, %s34_s22 }
   0xb   :  { %p6904_p3 = scmp.ne.s32.totalorder %s34_s22, %s6903_s8  ;;  %p6909_p5 = scmp.lt.s32.totalorder %s6903_s8, %s6903_s8 }
   0xd   :  { %p6910_p6 = por %p6909_p5, %p6908_p4 }
   0xf   :  { %p6911_p7 = pnand %p6910_p6, %p6904_p3 }
  0x11   :  { %6914 = shalt.err (!%p6911_p7)
}
  0x12   :  { %s6989_s9 = smov 128   ;;  %s6990_s10 = smov 8  }
  0x13   :  { %39 = dma.hbm_to_vmem [thread:$0]  %s7836_s2, 1280, %s34_s22, [#allocation6], %s6989_s9, %s6989_s9, %s6990_s10  }
  0x14   :  { %s6915_s15 = scalar_lea.hbm %s7835_s1, 768 }
  0x15   :  { %p6916_p8 = scmp.ne.s32.totalorder %s7835_s1, %s6915_s15  ;;  %p6919_p9 = scmp.lt.u32.totalorder %s6915_s15, %s7835_s1 }
  0x17   :  { %p6921_p10 = pnand %p6919_p9, %p6916_p8 }
  0x19   :  { %6924 = shalt.err (!%p6921_p10)
}
  0x1a   :  { %s6925_s20 = scalar_lea.vmem %s7040_s24, 768  ;;  %p6930_p12 = scmp.lt.s32.totalorder %s7040_s24, %s7040_s24 }
  0x1b   :  { %p6926_p11 = scmp.ne.s32.totalorder %s7040_s24, %s6925_s20  ;;  %p6931_p13 = scmp.lt.s32.totalorder %s6925_s20, %s6925_s20 }
  0x1d   :  { %p6932_p0 = por %p6931_p13, %p6930_p12 }
  0x1f   :  { %p6933_p1 = pnand %p6932_p0, %p6926_p11 }
  0x21   :  { %6936 = shalt.err (!%p6933_p1)
}
  0x22   :  { %27 = dma.hbm_to_vmem [thread:$0]  %s7835_s1, 768, %s7040_s24, [#allocation3], %s6989_s9, %s6989_s9, %s6990_s10  }
  0x23   :  { %s6991_s22 = smov [#allocation7]   ;;  %s6937_s27 = scalar_lea.hbm %s7837_s3, 1408 }
  0x24   :  { %s45_s23 = sshll.u32 %s6991_s22, 4  ;;  %p6938_p2 = scmp.ne.s32.totalorder %s7837_s3, %s6937_s27  ;;  %s46_s23 = int_to_ptr.vmem [resolvable:$true] %s45_s23 }
  0x25   :  { %p6941_p3 = scmp.lt.u32.totalorder %s6937_s27, %s7837_s3 }
  0x27   :  { %p6943_p4 = pnand %p6941_p3, %p6938_p2 }
  0x29   :  { %6946 = shalt.err (!%p6943_p4)
}
  0x2a   :  { %s6947_s8 = scalar_lea.vmem %s46_s23, 1408  ;;  %p6952_p6 = scmp.lt.s32.totalorder %s46_s23, %s46_s23 }
  0x2b   :  { %p6948_p5 = scmp.ne.s32.totalorder %s46_s23, %s6947_s8  ;;  %p6953_p7 = scmp.lt.s32.totalorder %s6947_s8, %s6947_s8 }
  0x2d   :  { %p6954_p8 = por %p6953_p7, %p6952_p6 }
  0x2f   :  { %p6955_p9 = pnand %p6954_p8, %p6948_p5 }
  0x31   :  { %6958 = shalt.err (!%p6955_p9)
}
  0x32   :  { %51 = dma.hbm_to_vmem [thread:$0]  %s7837_s3, 1408, %s46_s23, [#allocation6], %s6989_s9, %s6989_s9, %s6990_s10  }
  0x33   :  { %6981 = dma.done.wait [#allocation3], 768  }
  0x34   :  { %6982 = vsyncadd [#allocation3], 4294966528 }
  0x35   :  { %6983 = dma.done.wait [#allocation6], 2688  }
  0x36   :  { %6984 = vsyncadd [#allocation6], 4294964608  ;;  %vm85_vm0 = vcmask 1043456   ;;  %vm78_vm1 = vcmask 31744   ;;  %v67_v0 = vld [vmem:[#allocation2] sm:$0xf] }
  0x37   :  { %v65_v1 = vld [vmem:[%s7834_s0] sm:$0xff]  ;;  %v66_v2 = vld [vmem:[%s7834_s0 + $0x8] sm:$0xff]  ;;  %6267 = vmatprep.subr.msk.mxu0 %vm85_vm0, %v67_v0  ;;  %v6992_v5 = vmov 0.0   ;;  %s6993_s3 = smov 112   ;;  %s6994_s9 = smov 120   ;;  %vm6995_vm2 = vmmov 0  }
  0x38   :  { %6269 = vmatprep.mubr.msk.f32.mxu0 %vm78_vm1, %v65_v1  ;;  %6268 = vmatpush3.msk.msra.mxu0 %vm85_vm0, %v67_v0  ;;  %v5983_v3 = vld [vmem:[#allocation2 + $0x4] ss:$0 sm:$0xff]  ;;  %s6996_s0 = smov 104   ;;  %s6997_s15 = smov 96   ;;  %vm180_vm3 = vcmask 64512   ;;  %vm1517_vm4 = vcmask 130048  }
  0x39   :  { %6270 = vmatmul.mubr.msk.f32.vlgmr.msra.gmra.mrb[0].mxu0 %vm78_vm1, %v66_v2  ;;  %6272 = vmatprep.subr.mxu1 %v6992_v5  ;;  %s6998_s16 = smov 64   ;;  %s6999_s17 = smov 16   ;;  %vm1520_vm5 = vcmask 195584   ;;  %vm1529_vm6 = vcmask 261120   ;;  %vm4023_vm7 = vcmask 57344   ;;  %vm4753_vm8 = vcmask 1041409  }
  0x3a   :  { %6277 = vmatprep.subr.mxu0 %v6992_v5  ;;  %6274 = vmatprep.mubr.msk.f32.mxu1 %vm6995_vm2, %v6992_v5  ;;  %s7000_s18 = smov 24   ;;  %vm5094_vm9 = vcmask 1040384   ;;  %vm5090_vm10 = vcmask 7168   ;;  %vm5962_vm11 = vcmask 24576  }
  0x3b   :  { %6279 = vmatprep.mubr.msk.f32.mxu0 %vm6995_vm2, %v6992_v5 }
 0x10c   :  { %v6271_v4 = vpop.f32.mrb[0].mxu0 }
 0x10d   :  { %v155_v6 = vpop.f32.mrb[1].mxu0  ;;  %v7110_v8 = vadd.f32 %v6271_v4, %v5983_v3 }
 0x10e   :  { %v7100_v7 = vadd.f32 %v5983_v3, %v155_v6 }
 0x110   :  { %170 = vrot.lane.b32.xlu1 %v7100_v7, %s6993_s3  ;;  %166 = vrot.lane.b32.xlu0 %v7100_v7, %s6994_s9 }
 0x114   :  { %172 = vrot.lane.b32.xlu1 %v7110_v8, %s6993_s3  ;;  %168 = vrot.lane.b32.xlu0 %v7110_v8, %s6994_s9 }
 0x118   :  { %176 = vrot.lane.b32.xlu1 %v7110_v8, %s6996_s0  ;;  %174 = vrot.lane.b32.xlu0 %v7100_v7, %s6996_s0 }
 0x11c   :  { %255 = vrot.lane.b32.xlu1 %v7110_v8, %s6997_s15  ;;  %178 = vrot.lane.b32.xlu0 %v7100_v7, %s6997_s15 }
 0x182   :  { %v7124_v9 = vpop.permute.xlu1 %170  ;;  %v7126_v10 = vpop.permute.xlu0 %166 }
 0x183   :  { %331 = vrot.lane.b32.xlu0 %v7126_v10, %s6997_s15 }
 0x186   :  { %v7130_v11 = vpop.permute.xlu1 %172  ;;  %v7132_v12 = vpop.permute.xlu0 %168 }
 0x187   :  { %483 = vrot.lane.b32.xlu0 %v7124_v9, %s6997_s15  ;;  %407 = vrot.lane.b32.xlu1 %v7132_v12, %s6997_s15 }
 0x18a   :  { %v7138_v13 = vpop.permute.xlu1 %176  ;;  %v7140_v14 = vpop.permute.xlu0 %174 }
 0x18b   :  { %559 = vrot.lane.b32.xlu1 %v7130_v11, %s6997_s15  ;;  %635 = vrot.lane.b32.xlu0 %v7140_v14, %s6997_s15 }
 0x18e   :  { %v256_v15 = vpop.permute.xlu1 %255  ;;  %v179_v16 = vpop.permute.xlu0 %178 }
 0x18f   :  { %6278 = vmatpush3.xpose.msk.msra.mxu0 %vm180_vm3, %v256_v15  ;;  %711 = vrot.lane.b32.xlu1 %v7138_v13, %s6997_s15 }
 0x190   :  { %6273 = vmatpush3.xpose.msk.msra.mxu1 %vm180_vm3, %v179_v16  ;;  %6287 = vmatprep.subr.mxu0 %v6992_v5 }
 0x191   :  { %6282 = vmatprep.subr.mxu1 %v6992_v5 }
 0x192   :  { %6280 = vmatmul.mubr.msk.f32.vlgmr.msra.gmra.mrb[2].mxu0 %vm180_vm3, %v7110_v8 }
 0x193   :  { %6275 = vmatmul.mubr.msk.f32.vlgmr.msra.gmra.mrb[0].mxu1 %vm180_vm3, %v7100_v7  ;;  %6289 = vmatprep.mubr.msk.f32.mxu0 %vm6995_vm2, %v6992_v5 }
 0x194   :  { %6284 = vmatprep.mubr.msk.f32.mxu1 %vm6995_vm2, %v6992_v5 }
 0x1f5   :  { %v332_v17 = vpop.permute.xlu0 %331 }
 0x1f6   :  { %6283 = vmatpush3.xpose.msk.msra.mxu1 %vm180_vm3, %v332_v17 }
 0x1f7   :  { %6292 = vmatprep.subr.mxu1 %v6992_v5 }
 0x1f9   :  { %v408_v18 = vpop.permute.xlu1 %407  ;;  %6285 = vmatmul.mubr.msk.f32.vlgmr.msra.gmra.mrb[2].mxu1 %vm180_vm3, %v7126_v10  ;;  %v484_v19 = vpop.permute.xlu0 %483 }
 0x1fa   :  { %6288 = vmatpush3.xpose.msk.msra.mxu0 %vm180_vm3, %v408_v18  ;;  %6293 = vmatpush3.xpose.msk.msra.mxu1 %vm180_vm3, %v484_v19 }
 0x1fb   :  { %6294 = vmatprep.mubr.msk.f32.mxu1 %vm6995_vm2, %v6992_v5  ;;  %6297 = vmatprep.subr.mxu0 %v6992_v5 }
 0x1fc   :  { %6302 = vmatprep.subr.mxu1 %v6992_v5 }
 0x1fd   :  { %6290 = vmatmul.mubr.msk.f32.vlgmr.msra.gmra.mrb[4].mxu0 %vm180_vm3, %v7132_v12  ;;  %v560_v20 = vpop.permute.xlu1 %559  ;;  %6295 = vmatmul.mubr.msk.f32.vlgmr.msra.gmra.mrb[4].mxu1 %vm180_vm3, %v7124_v9  ;;  %v636_v21 = vpop.permute.xlu0 %635 }
 0x1fe   :  { %6298 = vmatpush3.xpose.msk.msra.mxu0 %vm180_vm3, %v560_v20  ;;  %6303 = vmatpush3.xpose.msk.msra.mxu1 %vm180_vm3, %v636_v21 }
 0x1ff   :  { %6299 = vmatprep.mubr.msk.f32.mxu0 %vm6995_vm2, %v6992_v5  ;;  %6304 = vmatprep.mubr.msk.f32.mxu1 %vm6995_vm2, %v6992_v5 }
 0x200   :  { %6307 = vmatprep.subr.mxu0 %v6992_v5  ;;  %6312 = vmatprep.subr.mxu1 %v6992_v5 }
 0x201   :  { %6300 = vmatmul.mubr.msk.f32.vlgmr.msra.gmra.mrb[6].mxu0 %vm180_vm3, %v7130_v11  ;;  %v712_v22 = vpop.permute.xlu1 %711  ;;  %6305 = vmatmul.mubr.msk.f32.vlgmr.msra.gmra.mrb[6].mxu1 %vm180_vm3, %v7140_v14 }
 0x202   :  { %6308 = vmatpush3.xpose.msk.msra.mxu0 %vm180_vm3, %v712_v22  ;;  %6309 = vmatprep.mubr.msk.f32.mxu0 %vm6995_vm2, %v6992_v5 }
 0x203   :  { %6317 = vmatprep.subr.mxu0 %v6992_v5  ;;  %6314 = vmatprep.mubr.msk.f32.mxu1 %vm6995_vm2, %v6992_v5 }
 0x205   :  { %6310 = vmatmul.mubr.msk.f32.vlgmr.msra.gmra.mrb[8].mxu0 %vm180_vm3, %v7138_v13 }
 0x206   :  { %6319 = vmatprep.mubr.msk.f32.mxu0 %vm6995_vm2, %v6992_v5 }
 0x265   :  { %v327_v23 = vpop.f32.mrb[2].mxu0 }
 0x266   :  { %v251_v24 = vpop.f32.mrb[0].mxu1  ;;  %v788_v25 = vmul.f32 0.17677669, %v327_v23  ;;  %v6281_v26 = vpop.f32.mrb[3].mxu0 }
 0x267   :  { %v787_v27 = vmul.f32 0.17677669, %v251_v24  ;;  %v6276_v28 = vpop.f32.mrb[1].mxu1 }
 0x268   :  { %v798_v29 = vsel %vm180_vm3, %v788_v25, -inf }
 0x269   :  { %799 = vmax.xlane.f32.xlu1 %v798_v29  ;;  %v795_v30 = vsel %vm180_vm3, %v787_v27, -inf }
 0x26a   :  { %796 = vmax.xlane.f32.xlu0 %v795_v30 }
 0x2cc   :  { %v403_v31 = vpop.f32.mrb[2].mxu1 }
 0x2cd   :  { %v789_v32 = vmul.f32 0.17677669, %v403_v31  ;;  %v6286_v33 = vpop.f32.mrb[3].mxu1 }
 0x2cf   :  { %v801_v34 = vsel %vm180_vm3, %v789_v32, -inf }
 0x2d0   :  { %v479_v35 = vpop.f32.mrb[4].mxu0  ;;  %802 = vmax.xlane.f32.xlu0 %v801_v34  ;;  %v555_v36 = vpop.f32.mrb[4].mxu1 }
 0x2d1   :  { %v790_v37 = vmul.f32 0.17677669, %v479_v35  ;;  %v791_v38 = vmul.f32 0.17677669, %v555_v36  ;;  %v6291_v39 = vpop.f32.mrb[5].mxu0  ;;  %v6296_v40 = vpop.f32.mrb[5].mxu1 }
 0x2d3   :  { %v804_v41 = vsel %vm180_vm3, %v790_v37, -inf  ;;  %v807_v42 = vsel %vm180_vm3, %v791_v38, -inf }
 0x2d4   :  { %v631_v43 = vpop.f32.mrb[6].mxu0  ;;  %805 = vmax.xlane.f32.xlu0 %v804_v41  ;;  %808 = vmax.xlane.f32.xlu1 %v807_v42  ;;  %v707_v44 = vpop.f32.mrb[6].mxu1 }
 0x2d5   :  { %v792_v45 = vmul.f32 0.17677669, %v631_v43  ;;  %v793_v46 = vmul.f32 0.17677669, %v707_v44  ;;  %v6301_v47 = vpop.f32.mrb[7].mxu0  ;;  %v6306_v48 = vpop.f32.mrb[7].mxu1 }
 0x2d7   :  { %v810_v49 = vsel %vm180_vm3, %v792_v45, -inf  ;;  %v813_v50 = vsel %vm180_vm3, %v793_v46, -inf }
 0x2d8   :  { %v783_v51 = vpop.f32.mrb[8].mxu0  ;;  %811 = vmax.xlane.f32.xlu0 %v810_v49  ;;  %814 = vmax.xlane.f32.xlu1 %v813_v50 }
 0x2d9   :  { %v794_v52 = vmul.f32 0.17677669, %v783_v51  ;;  %v6311_v53 = vpop.f32.mrb[9].mxu0 }
 0x2db   :  { %v816_v54 = vsel %vm180_vm3, %v794_v52, -inf }
 0x2dc   :  { %817 = vmax.xlane.f32.xlu0 %v816_v54 }
 0x2e9   :  { %883 = vrot.lane.b32.xlu1 %v7100_v7, %s6998_s16 }
 0x2ed   :  { %1035 = vrot.lane.b32.xlu1 %v7126_v10, %s6998_s16 }
 0x2f1   :  { %1111 = vrot.lane.b32.xlu1 %v7132_v12, %s6998_s16 }
 0x2f2   :  { %959 = vrot.lane.b32.xlu0 %v7110_v8, %s6998_s16 }
 0x2f5   :  { %1263 = vrot.lane.b32.xlu1 %v7130_v11, %s6998_s16 }
 0x2f6   :  { %1187 = vrot.lane.b32.xlu0 %v7124_v9, %s6998_s16  ;;  %v800_v55 = vpop.xlane.xlu1 %799 }
 0x2f7   :  { %v820_v56 = vsub.f32 %v788_v25, %v800_v55  ;;  %v797_v57 = vpop.xlane.xlu0 %796 }
 0x2f8   :  { %v819_v59 = vsub.f32 %v787_v27, %v797_v57 }
 0x2f9   :  { %v829_v58 = vmul.f32 1.442695, %v820_v56 }
 0x2fa   :  { %v827_v60 = vmul.f32 1.442695, %v819_v59 }
 0x2fb   :  { %6741 = vpow2.f32 %v829_v58 }
 0x2fc   :  { %6743 = vpow2.f32 %v827_v60 }
 0x305   :  { %v7216_v61 = vpop.eup %6741 }
 0x306   :  { %v846_v62 = vsel %vm180_vm3, %v7216_v61, 0.0  ;;  %v7220_v63 = vpop.eup %6743 }
 0x307   :  { %v843_v0 = vsel %vm180_vm3, %v7220_v63, 0.0 }
 0x315   :  { %847 = vadd.xlane.f32.xlu0 %v846_v62 }
 0x319   :  { %844 = vadd.xlane.f32.xlu1 %v843_v0 }
 0x35d   :  { %v803_v1 = vpop.xlane.xlu0 %802 }
 0x35e   :  { %v821_v2 = vsub.f32 %v789_v32, %v803_v1 }
 0x360   :  { %v831_v3 = vmul.f32 1.442695, %v821_v2 }
 0x361   :  { %v809_v4 = vpop.xlane.xlu1 %808  ;;  %v806_v6 = vpop.xlane.xlu0 %805 }
 0x362   :  { %6745 = vpow2.f32 %v831_v3  ;;  %v823_v9 = vsub.f32 %v791_v38, %v809_v4  ;;  %v822_v10 = vsub.f32 %v790_v37, %v806_v6 }
 0x364   :  { %v835_v11 = vmul.f32 1.442695, %v823_v9  ;;  %v833_v12 = vmul.f32 1.442695, %v822_v10  ;;  %v69_v9 = vld [vmem:[#allocation2 + $0x8] sm:$0xff]  ;;  %v70_v10 = vld [vmem:[#allocation2 + $0x10] sm:$0xff] }
 0x365   :  { %v815_v15 = vpop.xlane.xlu1 %814  ;;  %v812_v16 = vpop.xlane.xlu0 %811 }
 0x366   :  { %6747 = vpow2.f32 %v835_v11  ;;  %v825_v17 = vsub.f32 %v793_v46, %v815_v15  ;;  %v824_v18 = vsub.f32 %v792_v45, %v812_v16  ;;  %v6651_v11 = vpack.c.bf16 %v70_v10, %v69_v9  ;;  %v72_v15 = vld [vmem:[#allocation2 + $0x20] sm:$0xff] }
 0x367   :  { %6749 = vpow2.f32 %v833_v12  ;;  %v71_v12 = vld [vmem:[#allocation2 + $0x18] sm:$0xff] }
 0x368   :  { %v839_v19 = vmul.f32 1.442695, %v825_v17  ;;  %v837_v20 = vmul.f32 1.442695, %v824_v18  ;;  %v6655_v16 = vpack.c.bf16 %v72_v15, %v71_v12 }
 0x369   :  { %v884_v21 = vpop.permute.xlu1 %883  ;;  %v818_v22 = vpop.xlane.xlu0 %817 }
 0x36a   :  { %6751 = vpow2.f32 %v839_v19  ;;  %v826_v23 = vsub.f32 %v794_v52, %v818_v22  ;;  %6313 = vmatpush3.msra.mxu1 %v884_v21 }
 0x36b   :  { %6753 = vpow2.f32 %v837_v20  ;;  %6322 = vmatprep.subr.mxu1 %v6992_v5 }
 0x36c   :  { %v6746_v24 = vpop.eup %6745  ;;  %v841_v25 = vmul.f32 1.442695, %v826_v23 }
 0x36d   :  { %v960_v26 = vpop.permute.xlu0 %959  ;;  %v849_v27 = vsel %vm180_vm3, %v6746_v24, 0.0  ;;  %v1036_v38 = vpop.permute.xlu1 %1035 }
 0x36e   :  { %6755 = vpow2.f32 %v841_v25  ;;  %850 = vadd.xlane.f32.xlu1 %v849_v27  ;;  %6318 = vmatpush3.msra.mxu0 %v960_v26 }
 0x36f   :  { %6327 = vmatprep.subr.mxu0 %v6992_v5 }
 0x370   :  { %v6748_v28 = vpop.eup %6747 }
 0x371   :  { %v6750_v29 = vpop.eup %6749  ;;  %v855_v30 = vsel %vm180_vm3, %v6748_v28, 0.0  ;;  %v1112_v39 = vpop.permute.xlu1 %1111 }
 0x372   :  { %856 = vadd.xlane.f32.xlu1 %v855_v30  ;;  %v852_v31 = vsel %vm180_vm3, %v6750_v29, 0.0  ;;  %v1188_v40 = vpop.permute.xlu0 %1187 }
 0x373   :  { %853 = vadd.xlane.f32.xlu0 %v852_v31 }
 0x374   :  { %v6752_v32 = vpop.eup %6751 }
 0x375   :  { %v7229_v33 = vpop.eup %6753  ;;  %v861_v34 = vsel %vm180_vm3, %v6752_v32, 0.0  ;;  %v1264_v41 = vpop.permute.xlu1 %1263 }
 0x376   :  { %862 = vadd.xlane.f32.xlu1 %v861_v34  ;;  %v858_v35 = vsel %vm180_vm3, %v7229_v33, 0.0 }
 0x377   :  { %859 = vadd.xlane.f32.xlu0 %v858_v35 }
 0x378   :  { %v7234_v36 = vpop.eup %6755 }
 0x379   :  { %v864_v37 = vsel %vm180_vm3, %v7234_v36, 0.0 }
 0x37b   :  { %865 = vadd.xlane.f32.xlu0 %v864_v37 }
 0x387   :  { %1415 = vrot.lane.b32.xlu1 %v7138_v13, %s6998_s16 }
 0x391   :  { %1339 = vrot.lane.b32.xlu0 %v7140_v14, %s6998_s16 }
 0x3a2   :  { %v848_v42 = vpop.xlane.xlu0 %847 }
 0x3a3   :  { %6757 = vrcp.f32 %v848_v42 }
 0x3a6   :  { %v845_v43 = vpop.xlane.xlu1 %844 }
 0x3a7   :  { %6759 = vrcp.f32 %v845_v43  ;;  %v1627_v43 = vld [vmem:[#allocation5] sm:$0xff] }
 0x3ad   :  { %v6758_v44 = vpop.eup %6757 }
 0x3ae   :  { %v876_v45 = vmul.f32 %v6758_v44, %v7216_v61  ;;  %v1628_v44 = vld [vmem:[#allocation5 + $0x8] sm:$0xff] }
 0x3b0   :  { %6320 = vmatmul.mubr.msk.f32.vlgmr.msra.gmra.mrb[10].mxu0 %vm180_vm3, %v876_v45  ;;  %v6659_v45 = vpack.c.bf16 %v1628_v44, %v1627_v43 }
 0x3b1   :  { %v6760_v46 = vpop.eup %6759  ;;  %6328 = vmatpush3.msra.mxu0 %v1112_v39  ;;  %6329 = vmatprep.mubr.msk.f32.mxu0 %vm6995_vm2, %v6992_v5 }
 0x3b2   :  { %v875_v13 = vmul.f32 %v6760_v46, %v7220_v63  ;;  %6337 = vmatprep.subr.mxu0 %v6992_v5  ;;  %v1630_v46 = vld [vmem:[#allocation5 + $0x18] sm:$0xff] }
 0x3b4   :  { %6315 = vmatmul.mubr.msk.f32.vlgmr.msra.gmra.mrb[8].mxu1 %vm180_vm3, %v875_v13 }
 0x3b5   :  { %6323 = vmatpush3.msra.mxu1 %v1036_v38  ;;  %6324 = vmatprep.mubr.msk.f32.mxu1 %vm6995_vm2, %v6992_v5 }
 0x3b6   :  { %6332 = vmatprep.subr.mxu1 %v6992_v5 }
 0x3fb   :  { %v851_v14 = vpop.xlane.xlu1 %850 }
 0x3fc   :  { %6761 = vrcp.f32 %v851_v14  ;;  %v6011_v14 = vld [vmem:[#allocation2 + $0x28] ss:$0 sm:$0xff] }
 0x3ff   :  { %v857_v47 = vpop.xlane.xlu1 %856 }
 0x400   :  { %6763 = vrcp.f32 %v857_v47  ;;  %v854_v48 = vpop.xlane.xlu0 %853 }
 0x401   :  { %6765 = vrcp.f32 %v854_v48 }
 0x403   :  { %v863_v49 = vpop.xlane.xlu1 %862 }
 0x404   :  { %6767 = vrcp.f32 %v863_v49  ;;  %v860_v50 = vpop.xlane.xlu0 %859 }
 0x405   :  { %6769 = vrcp.f32 %v860_v50 }
 0x406   :  { %v6762_v51 = vpop.eup %6761 }
 0x407   :  { %v877_v52 = vmul.f32 %v6762_v51, %v6746_v24  ;;  %v1416_v63 = vpop.permute.xlu1 %1415 }
 0x408   :  { %v866_v53 = vpop.xlane.xlu0 %865 }
 0x409   :  { %6771 = vrcp.f32 %v866_v53  ;;  %6325 = vmatmul.mubr.msk.f32.vlgmr.msra.gmra.mrb[10].mxu1 %vm180_vm3, %v877_v52 }
 0x40a   :  { %v6764_v54 = vpop.eup %6763  ;;  %6333 = vmatpush3.msra.mxu1 %v1188_v40  ;;  %6334 = vmatprep.mubr.msk.f32.mxu1 %vm6995_vm2, %v6992_v5 }
 0x40b   :  { %v6766_v55 = vpop.eup %6765  ;;  %6342 = vmatprep.subr.mxu1 %v6992_v5  ;;  %v879_v56 = vmul.f32 %v6764_v54, %v6748_v28 }
 0x40c   :  { %v1340_v57 = vpop.permute.xlu0 %1339  ;;  %v878_v58 = vmul.f32 %v6766_v55, %v6750_v29 }
 0x40d   :  { %6335 = vmatmul.mubr.msk.f32.vlgmr.msra.gmra.mrb[12].mxu1 %vm180_vm3, %v879_v56 }
 0x40e   :  { %v6768_v59 = vpop.eup %6767  ;;  %6330 = vmatmul.mubr.msk.f32.vlgmr.msra.gmra.mrb[12].mxu0 %vm180_vm3, %v878_v58  ;;  %6343 = vmatpush3.msra.mxu1 %v1340_v57 }
 0x40f   :  { %v6770_v60 = vpop.eup %6769  ;;  %6338 = vmatpush3.msra.mxu0 %v1264_v41  ;;  %6339 = vmatprep.mubr.msk.f32.mxu0 %vm6995_vm2, %v6992_v5  ;;  %v881_v61 = vmul.f32 %v6768_v59, %v6752_v32 }
 0x410   :  { %6344 = vmatprep.mubr.msk.f32.mxu1 %vm6995_vm2, %v6992_v5  ;;  %6347 = vmatprep.subr.mxu0 %v6992_v5  ;;  %v880_v62 = vmul.f32 %v6770_v60, %v7229_v33 }
 0x411   :  { %6345 = vmatmul.mubr.msk.f32.vlgmr.msra.gmra.mrb[14].mxu1 %vm180_vm3, %v881_v61  ;;  %6652 = vmatprep.subr.bf16.mxu1 %v6651_v11 }
 0x412   :  { %6340 = vmatmul.mubr.msk.f32.vlgmr.msra.gmra.mrb[14].mxu0 %vm180_vm3, %v880_v62  ;;  %6654 = vmatpush3.bf16.msra.mxu1 %v6651_v11  ;;  %v6016_v62 = vld [vmem:[#allocation5 + $0x20] ss:$0 sm:$0xff] }
 0x413   :  { %v6772_v0 = vpop.eup %6771  ;;  %6348 = vmatpush3.msra.mxu0 %v1416_v63  ;;  %6349 = vmatprep.mubr.msk.f32.mxu0 %vm6995_vm2, %v6992_v5 }
 0x414   :  { %v882_v1 = vmul.f32 %v6772_v0, %v7234_v36  ;;  %6656 = vmatprep.subr.bf16.mxu1 %v6655_v16  ;;  %6660 = vmatprep.subr.bf16.mxu0 %v6659_v45 }
 0x416   :  { %6350 = vmatmul.mubr.msk.f32.vlgmr.msra.gmra.mrb[16].mxu0 %vm180_vm3, %v882_v1  ;;  %6658 = vmatpush3.bf16.msra.mxu1 %v6655_v16 }
 0x417   :  { %6374 = vmatprep.subr.mxu1 %v6992_v5  ;;  %6662 = vmatpush3.bf16.msra.mxu0 %v6659_v45 }
 0x483   :  { %v1031_v2 = vpop.f32.mrb[10].mxu0 }
 0x484   :  { %v6321_v3 = vpop.f32.mrb[11].mxu0 }
 0x487   :  { %v955_v4 = vpop.f32.mrb[8].mxu1 }
 0x488   :  { %v6316_v6 = vpop.f32.mrb[9].mxu1 }
 0x4dc   :  { %v1107_v17 = vpop.f32.mrb[10].mxu1 }
 0x4dd   :  { %v6326_v18 = vpop.f32.mrb[11].mxu1  ;;  %1493 = vrot.lane.b32.xlu0 %v1107_v17, %s6990_s10 }
 0x4e0   :  { %v1259_v19 = vpop.f32.mrb[12].mxu1 }
 0x4e1   :  { %v1183_v20 = vpop.f32.mrb[12].mxu0  ;;  %1501 = vrot.lane.b32.xlu0 %v1259_v19, %s6999_s17  ;;  %v6336_v21 = vpop.f32.mrb[13].mxu1 }
 0x4e2   :  { %1495 = vrot.lane.b32.xlu1 %v1183_v20, %s6990_s10  ;;  %v6331_v22 = vpop.f32.mrb[13].mxu0 }
 0x4e4   :  { %v1411_v23 = vpop.f32.mrb[14].mxu1 }
 0x4e5   :  { %v1335_v24 = vpop.f32.mrb[14].mxu0  ;;  %1509 = vrot.lane.b32.xlu0 %v1411_v23, %s7000_s18  ;;  %v6346_v25 = vpop.f32.mrb[15].mxu1 }
 0x4e6   :  { %1503 = vrot.lane.b32.xlu1 %v1335_v24, %s6999_s17  ;;  %v6341_v26 = vpop.f32.mrb[15].mxu0 }
 0x4e9   :  { %v1487_v27 = vpop.f32.mrb[16].mxu0 }
 0x4ea   :  { %1511 = vrot.lane.b32.xlu1 %v1487_v27, %s7000_s18  ;;  %v6351_v28 = vpop.f32.mrb[17].mxu0 }
 0x54f   :  { %v1494_v29 = vpop.permute.xlu0 %1493 }
 0x550   :  { %v1515_v32 = vsel %vm180_vm3, %v955_v4, %v1494_v29 }
 0x553   :  { %v1502_v30 = vpop.permute.xlu0 %1501 }
 0x554   :  { %v1496_v31 = vpop.permute.xlu1 %1495  ;;  %v1518_v33 = vsel %vm1517_vm4, %v1515_v32, %v1502_v30 }
 0x555   :  { %v1516_v38 = vsel %vm180_vm3, %v1031_v2, %v1496_v31 }
 0x557   :  { %v1510_v34 = vpop.permute.xlu0 %1509 }
 0x558   :  { %v1504_v35 = vpop.permute.xlu1 %1503  ;;  %v1521_v36 = vsel %vm1520_vm5, %v1518_v33, %v1510_v34 }
 0x559   :  { %v1523_v37 = vadd.f32 %v1521_v36, %v7100_v7  ;;  %v1519_v39 = vsel %vm1517_vm4, %v1516_v38, %v1504_v35  ;;  %v1629_v7 = vld [vmem:[#allocation5 + $0x10] sm:$0xff] }
 0x55a   :  { %v6663_v13 = vpack.c.bf16 %v1630_v46, %v1629_v7 }
 0x55b   :  { %6360 = vmatprep.mubr.msk.f32.mxu1 %vm1529_vm6, %v1523_v37 }
 0x55c   :  { %v1512_v40 = vpop.permute.xlu1 %1511  ;;  %6664 = vmatprep.subr.bf16.mxu0 %v6663_v13 }
 0x55d   :  { %v1522_v41 = vsel %vm1520_vm5, %v1519_v39, %v1512_v40  ;;  %6666 = vmatpush3.bf16.msra.mxu0 %v6663_v13 }
 0x55e   :  { %v1524_v42 = vadd.f32 %v1522_v41, %v7110_v8  ;;  %6379 = vmatprep.subr.mxu0 %v6992_v5 }
 0x560   :  { %6361 = vmatmul.mubr.msk.f32.vlgmr.msra.gmra.mrb[16].mxu1 %vm1529_vm6, %v1524_v42 }
 0x561   :  { %6376 = vmatprep.mubr.msk.f32.mxu1 %vm6995_vm2, %v6992_v5 }
 0x633   :  { %v6362_v47 = vpop.f32.mrb[16].mxu1 }
 0x634   :  { %v1608_v8 = vadd.f32 %v6362_v47, %v6011_v14  ;;  %v1602_v48 = vpop.f32.mrb[17].mxu1 }
 0x635   :  { %v1603_v49 = vadd.f32 %v6011_v14, %v1602_v48 }
 0x636   :  { %v6015_v50 = vmul.f32 -1.442695, %v1608_v8 }
 0x637   :  { %v6014_v51 = vmul.f32 -1.442695, %v1603_v49 }
 0x638   :  { %6773 = vpow2.f32 %v6015_v50 }
 0x639   :  { %6775 = vpow2.f32 %v6014_v51 }
 0x642   :  { %v6774_v52 = vpop.eup %6773 }
 0x643   :  { %v6776_v53 = vpop.eup %6775  ;;  %v1618_v54 = vadd.f32 1.0, %v6774_v52 }
 0x644   :  { %v1617_v55 = vadd.f32 1.0, %v6776_v53 }
 0x645   :  { %6777 = vrcp.f32 %v1618_v54 }
 0x646   :  { %6779 = vrcp.f32 %v1617_v55 }
 0x64f   :  { %v6778_v56 = vpop.eup %6777 }
 0x650   :  { %v6780_v57 = vpop.eup %6779  ;;  %v1624_v58 = vmul.f32 %v6778_v56, %v1608_v8 }
 0x651   :  { %v1623_v59 = vmul.f32 %v6780_v57, %v1603_v49 }
 0x652   :  { %v1626_v61 = vadd.f32 %v1624_v58, %v1524_v42 }
 0x653   :  { %v1625_v60 = vadd.f32 %v1623_v59, %v1523_v37 }
 0x655   :  { %6371 = vmatprep.mubr.msk.f32.mxu0 %vm1529_vm6, %v1625_v60 }
 0x656   :  { %6372 = vmatmul.mubr.msk.f32.vlgmr.msra.gmra.mrb[18].mxu0 %vm1529_vm6, %v1626_v61 }
 0x657   :  { %6381 = vmatprep.mubr.msk.f32.mxu0 %vm6995_vm2, %v6992_v5 }
 0x729   :  { %v6373_v63 = vpop.f32.mrb[18].mxu0 }
 0x72a   :  { %v7294_v0 = vadd.f32 %v6373_v63, %v6016_v62  ;;  %v1713_v1 = vpop.f32.mrb[19].mxu0 }
 0x72b   :  { %v7296_v2 = vadd.f32 %v6016_v62, %v1713_v1 }
 0x72c   :  { %1726 = vrot.lane.b32.xlu1 %v7294_v0, %s6994_s9 }
 0x72d   :  { %1724 = vrot.lane.b32.xlu0 %v7296_v2, %s6994_s9 }
 0x730   :  { %1730 = vrot.lane.b32.xlu1 %v7294_v0, %s6993_s3 }
 0x731   :  { %1728 = vrot.lane.b32.xlu0 %v7296_v2, %s6993_s3 }
 0x734   :  { %1734 = vrot.lane.b32.xlu1 %v7294_v0, %s6996_s0 }
 0x735   :  { %1732 = vrot.lane.b32.xlu0 %v7296_v2, %s6996_s0 }
 0x738   :  { %1812 = vrot.lane.b32.xlu1 %v7294_v0, %s6997_s15 }
 0x739   :  { %1736 = vrot.lane.b32.xlu0 %v7296_v2, %s6997_s15 }
 0x79e   :  { %v7314_v3 = vpop.permute.xlu1 %1726 }
 0x79f   :  { %1964 = vrot.lane.b32.xlu1 %v7314_v3, %s6997_s15  ;;  %v7318_v4 = vpop.permute.xlu0 %1724 }
 0x7a0   :  { %1888 = vrot.lane.b32.xlu0 %v7318_v4, %s6997_s15 }
 0x7a2   :  { %v7322_v6 = vpop.permute.xlu1 %1730 }
 0x7a3   :  { %2116 = vrot.lane.b32.xlu1 %v7322_v6, %s6997_s15  ;;  %v7326_v9 = vpop.permute.xlu0 %1728 }
 0x7a4   :  { %2040 = vrot.lane.b32.xlu0 %v7326_v9, %s6997_s15 }
 0x7a6   :  { %v7330_v10 = vpop.permute.xlu1 %1734 }
 0x7a7   :  { %2268 = vrot.lane.b32.xlu1 %v7330_v10, %s6997_s15  ;;  %v7334_v11 = vpop.permute.xlu0 %1732 }
 0x7a8   :  { %2192 = vrot.lane.b32.xlu0 %v7334_v11, %s6997_s15 }
 0x7aa   :  { %v1813_v12 = vpop.permute.xlu1 %1812 }
 0x7ab   :  { %6380 = vmatpush3.xpose.msk.msra.mxu0 %vm180_vm3, %v1813_v12  ;;  %v1737_v15 = vpop.permute.xlu0 %1736 }
 0x7ac   :  { %6375 = vmatpush3.xpose.msk.msra.mxu1 %vm180_vm3, %v1737_v15  ;;  %6389 = vmatprep.subr.mxu0 %v6992_v5 }
 0x7ad   :  { %6384 = vmatprep.subr.mxu1 %v6992_v5 }
 0x7ae   :  { %6382 = vmatmul.mubr.msk.f32.vlgmr.msra.gmra.mrb[20].mxu0 %vm180_vm3, %v7294_v0 }
 0x7af   :  { %6377 = vmatmul.mubr.msk.f32.vlgmr.msra.gmra.mrb[18].mxu1 %vm180_vm3, %v7296_v2  ;;  %6391 = vmatprep.mubr.msk.f32.mxu0 %vm6995_vm2, %v6992_v5 }
 0x7b0   :  { %6386 = vmatprep.mubr.msk.f32.mxu1 %vm6995_vm2, %v6992_v5 }
 0x811   :  { %v1965_v16 = vpop.permute.xlu1 %1964 }
 0x812   :  { %6390 = vmatpush3.xpose.msk.msra.mxu0 %vm180_vm3, %v1965_v16  ;;  %v1889_v17 = vpop.permute.xlu0 %1888 }
 0x813   :  { %6385 = vmatpush3.xpose.msk.msra.mxu1 %vm180_vm3, %v1889_v17  ;;  %6399 = vmatprep.subr.mxu0 %v6992_v5 }
 0x814   :  { %6394 = vmatprep.subr.mxu1 %v6992_v5 }
 0x815   :  { %6392 = vmatmul.mubr.msk.f32.vlgmr.msra.gmra.mrb[22].mxu0 %vm180_vm3, %v7314_v3  ;;  %v2117_v18 = vpop.permute.xlu1 %2116 }
 0x816   :  { %6387 = vmatmul.mubr.msk.f32.vlgmr.msra.gmra.mrb[20].mxu1 %vm180_vm3, %v7318_v4  ;;  %6400 = vmatpush3.xpose.msk.msra.mxu0 %vm180_vm3, %v2117_v18  ;;  %v2041_v19 = vpop.permute.xlu0 %2040 }
 0x817   :  { %6395 = vmatpush3.xpose.msk.msra.mxu1 %vm180_vm3, %v2041_v19  ;;  %6401 = vmatprep.mubr.msk.f32.mxu0 %vm6995_vm2, %v6992_v5 }
 0x818   :  { %6409 = vmatprep.subr.mxu0 %v6992_v5  ;;  %6396 = vmatprep.mubr.msk.f32.mxu1 %vm6995_vm2, %v6992_v5 }
 0x819   :  { %6402 = vmatmul.mubr.msk.f32.vlgmr.msra.gmra.mrb[24].mxu0 %vm180_vm3, %v7322_v6  ;;  %v2269_v20 = vpop.permute.xlu1 %2268  ;;  %6404 = vmatprep.subr.mxu1 %v6992_v5 }
 0x81a   :  { %6397 = vmatmul.mubr.msk.f32.vlgmr.msra.gmra.mrb[22].mxu1 %vm180_vm3, %v7326_v9  ;;  %6410 = vmatpush3.xpose.msk.msra.mxu0 %vm180_vm3, %v2269_v20  ;;  %v2193_v21 = vpop.permute.xlu0 %2192 }
 0x81b   :  { %6405 = vmatpush3.xpose.msk.msra.mxu1 %vm180_vm3, %v2193_v21  ;;  %6411 = vmatprep.mubr.msk.f32.mxu0 %vm6995_vm2, %v6992_v5 }
 0x81c   :  { %6406 = vmatprep.mubr.msk.f32.mxu1 %vm6995_vm2, %v6992_v5  ;;  %6414 = vmatprep.subr.mxu1 %v6992_v5 }
 0x81d   :  { %6412 = vmatmul.mubr.msk.f32.vlgmr.msra.gmra.mrb[26].mxu0 %vm180_vm3, %v7330_v10  ;;  %6419 = vmatprep.subr.mxu0 %v6992_v5 }
 0x81e   :  { %6407 = vmatmul.mubr.msk.f32.vlgmr.msra.gmra.mrb[24].mxu1 %vm180_vm3, %v7334_v11  ;;  %6421 = vmatprep.mubr.msk.f32.mxu0 %vm6995_vm2, %v6992_v5 }
 0x81f   :  { %6416 = vmatprep.mubr.msk.f32.mxu1 %vm6995_vm2, %v6992_v5 }
 0x881   :  { %v1884_v22 = vpop.f32.mrb[20].mxu0 }
 0x882   :  { %v2345_v23 = vmul.f32 0.17677669, %v1884_v22  ;;  %v1808_v24 = vpop.f32.mrb[18].mxu1  ;;  %v6383_v25 = vpop.f32.mrb[21].mxu0 }
 0x883   :  { %v2344_v26 = vmul.f32 0.17677669, %v1808_v24  ;;  %v6378_v27 = vpop.f32.mrb[19].mxu1 }
 0x884   :  { %v2355_v28 = vsel %vm180_vm3, %v2345_v23, -inf }
 0x885   :  { %2356 = vmax.xlane.f32.xlu1 %v2355_v28  ;;  %v2352_v29 = vsel %vm180_vm3, %v2344_v26, -inf }
 0x886   :  { %2353 = vmax.xlane.f32.xlu0 %v2352_v29 }
 0x8e8   :  { %v2036_v30 = vpop.f32.mrb[22].mxu0 }
 0x8e9   :  { %v1960_v31 = vpop.f32.mrb[20].mxu1  ;;  %v6393_v32 = vpop.f32.mrb[23].mxu0  ;;  %v2347_v35 = vmul.f32 0.17677669, %v2036_v30 }
 0x8ea   :  { %v2346_v33 = vmul.f32 0.17677669, %v1960_v31  ;;  %v6388_v34 = vpop.f32.mrb[21].mxu1 }
 0x8eb   :  { %v2361_v44 = vsel %vm180_vm3, %v2347_v35, -inf }
 0x8ec   :  { %v2188_v36 = vpop.f32.mrb[24].mxu0  ;;  %v2358_v37 = vsel %vm180_vm3, %v2346_v33, -inf }
 0x8ed   :  { %v6403_v38 = vpop.f32.mrb[25].mxu0  ;;  %2359 = vmax.xlane.f32.xlu0 %v2358_v37  ;;  %v2112_v39 = vpop.f32.mrb[22].mxu1  ;;  %v2349_v42 = vmul.f32 0.17677669, %v2188_v36 }
 0x8ee   :  { %v2348_v40 = vmul.f32 0.17677669, %v2112_v39  ;;  %v6398_v41 = vpop.f32.mrb[23].mxu1 }
 0x8ef   :  { %v2367_v8 = vsel %vm180_vm3, %v2349_v42, -inf }
 0x8f0   :  { %v2340_v43 = vpop.f32.mrb[26].mxu0  ;;  %v2364_v45 = vsel %vm180_vm3, %v2348_v40, -inf }
 0x8f1   :  { %v6413_v7 = vpop.f32.mrb[27].mxu0  ;;  %2362 = vmax.xlane.f32.xlu0 %v2361_v44  ;;  %2365 = vmax.xlane.f32.xlu1 %v2364_v45  ;;  %v2264_v46 = vpop.f32.mrb[24].mxu1  ;;  %v2351_v47 = vmul.f32 0.17677669, %v2340_v43 }
 0x8f2   :  { %v2350_v13 = vmul.f32 0.17677669, %v2264_v46  ;;  %v6408_v14 = vpop.f32.mrb[25].mxu1 }
 0x8f3   :  { %v2373_v49 = vsel %vm180_vm3, %v2351_v47, -inf }
 0x8f4   :  { %v2370_v48 = vsel %vm180_vm3, %v2350_v13, -inf }
 0x8f5   :  { %2368 = vmax.xlane.f32.xlu0 %v2367_v8  ;;  %2371 = vmax.xlane.f32.xlu1 %v2370_v48 }
 0x8f9   :  { %2374 = vmax.xlane.f32.xlu0 %v2373_v49 }
 0x906   :  { %2440 = vrot.lane.b32.xlu1 %v7296_v2, %s6998_s16 }
 0x90a   :  { %2592 = vrot.lane.b32.xlu1 %v7318_v4, %s6998_s16 }
 0x90e   :  { %2668 = vrot.lane.b32.xlu1 %v7314_v3, %s6998_s16 }
 0x90f   :  { %2516 = vrot.lane.b32.xlu0 %v7294_v0, %s6998_s16 }
 0x912   :  { %2820 = vrot.lane.b32.xlu1 %v7322_v6, %s6998_s16  ;;  %v2357_v50 = vpop.xlane.xlu1 %2356 }
 0x913   :  { %2744 = vrot.lane.b32.xlu0 %v7326_v9, %s6998_s16  ;;  %v2377_v51 = vsub.f32 %v2345_v23, %v2357_v50  ;;  %v2354_v52 = vpop.xlane.xlu0 %2353 }
 0x914   :  { %v2376_v54 = vsub.f32 %v2344_v26, %v2354_v52 }
 0x915   :  { %v2386_v53 = vmul.f32 1.442695, %v2377_v51 }
 0x916   :  { %v2384_v55 = vmul.f32 1.442695, %v2376_v54 }
 0x917   :  { %6781 = vpow2.f32 %v2386_v53 }
 0x918   :  { %6783 = vpow2.f32 %v2384_v55 }
 0x921   :  { %v7406_v56 = vpop.eup %6781 }
 0x922   :  { %v2403_v57 = vsel %vm180_vm3, %v7406_v56, 0.0  ;;  %v7410_v58 = vpop.eup %6783 }
 0x923   :  { %v2400_v59 = vsel %vm180_vm3, %v7410_v58, 0.0 }
 0x932   :  { %2404 = vadd.xlane.f32.xlu0 %v2403_v57 }
 0x936   :  { %2401 = vadd.xlane.f32.xlu1 %v2400_v59 }
 0x97a   :  { %v2360_v60 = vpop.xlane.xlu0 %2359 }
 0x97b   :  { %v2378_v61 = vsub.f32 %v2346_v33, %v2360_v60 }
 0x97d   :  { %v2388_v62 = vmul.f32 1.442695, %v2378_v61 }
 0x97e   :  { %v2366_v63 = vpop.xlane.xlu1 %2365  ;;  %v2363_v1 = vpop.xlane.xlu0 %2362 }
 0x97f   :  { %6785 = vpow2.f32 %v2388_v62  ;;  %v2380_v3 = vsub.f32 %v2348_v40, %v2366_v63  ;;  %v2379_v4 = vsub.f32 %v2347_v35, %v2363_v1 }
 0x981   :  { %v2392_v6 = vmul.f32 1.442695, %v2380_v3  ;;  %v2390_v9 = vmul.f32 1.442695, %v2379_v4  ;;  %v1632_v3 = vld [vmem:[#allocation5 + $0x28] sm:$0xff]  ;;  %v1633_v4 = vld [vmem:[#allocation5 + $0x30] sm:$0xff] }
 0x982   :  { %v2372_v12 = vpop.xlane.xlu1 %2371  ;;  %v2369_v15 = vpop.xlane.xlu0 %2368 }
 0x983   :  { %6787 = vpow2.f32 %v2392_v6  ;;  %v2382_v16 = vsub.f32 %v2350_v13, %v2372_v12  ;;  %v2381_v17 = vsub.f32 %v2349_v42, %v2369_v15  ;;  %v6667_v6 = vpack.c.bf16 %v1633_v4, %v1632_v3  ;;  %v1635_v12 = vld [vmem:[#allocation5 + $0x40] sm:$0xff] }
 0x984   :  { %6789 = vpow2.f32 %v2390_v9  ;;  %v1634_v9 = vld [vmem:[#allocation5 + $0x38] sm:$0xff] }
 0x985   :  { %v2396_v18 = vmul.f32 1.442695, %v2382_v16  ;;  %v2394_v19 = vmul.f32 1.442695, %v2381_v17  ;;  %v6671_v15 = vpack.c.bf16 %v1635_v12, %v1634_v9 }
 0x986   :  { %v2441_v20 = vpop.permute.xlu1 %2440  ;;  %v2375_v21 = vpop.xlane.xlu0 %2374 }
 0x987   :  { %6791 = vpow2.f32 %v2396_v18  ;;  %v2383_v22 = vsub.f32 %v2351_v47, %v2375_v21  ;;  %6415 = vmatpush3.msra.mxu1 %v2441_v20  ;;  %v3187_v20 = vld [vmem:[#allocation7 + $0x8] sm:$0xff] }
 0x988   :  { %6793 = vpow2.f32 %v2394_v19  ;;  %6424 = vmatprep.subr.mxu1 %v6992_v5  ;;  %v3186_v19 = vld [vmem:[#allocation7] sm:$0xff] }
 0x989   :  { %v6786_v23 = vpop.eup %6785  ;;  %v2398_v24 = vmul.f32 1.442695, %v2383_v22 }
 0x98a   :  { %v2517_v25 = vpop.permute.xlu0 %2516  ;;  %v2406_v26 = vsel %vm180_vm3, %v6786_v23, 0.0  ;;  %v2593_v37 = vpop.permute.xlu1 %2592 }
 0x98b   :  { %6795 = vpow2.f32 %v2398_v24  ;;  %2407 = vadd.xlane.f32.xlu1 %v2406_v26  ;;  %6420 = vmatpush3.msra.mxu0 %v2517_v25  ;;  %v3188_v24 = vld [vmem:[#allocation7 + $0x10] sm:$0xff]  ;;  %v3189_v25 = vld [vmem:[#allocation7 + $0x18] sm:$0xff] }
 0x98c   :  { %6429 = vmatprep.subr.mxu0 %v6992_v5 }
 0x98d   :  { %v6788_v27 = vpop.eup %6787 }
 0x98e   :  { %v6790_v28 = vpop.eup %6789  ;;  %v2412_v29 = vsel %vm180_vm3, %v6788_v27, 0.0  ;;  %v2669_v38 = vpop.permute.xlu1 %2668 }
 0x98f   :  { %2413 = vadd.xlane.f32.xlu1 %v2412_v29  ;;  %v2409_v30 = vsel %vm180_vm3, %v6790_v28, 0.0  ;;  %v2745_v39 = vpop.permute.xlu0 %2744 }
 0x990   :  { %2410 = vadd.xlane.f32.xlu0 %v2409_v30 }
 0x991   :  { %v6792_v31 = vpop.eup %6791 }
 0x992   :  { %v6794_v32 = vpop.eup %6793  ;;  %v2418_v33 = vsel %vm180_vm3, %v6792_v31, 0.0  ;;  %v2821_v40 = vpop.permute.xlu1 %2820 }
 0x993   :  { %2419 = vadd.xlane.f32.xlu1 %v2418_v33  ;;  %v2415_v34 = vsel %vm180_vm3, %v6794_v32, 0.0 }
 0x994   :  { %2416 = vadd.xlane.f32.xlu0 %v2415_v34 }
 0x995   :  { %v7421_v35 = vpop.eup %6795 }
 0x996   :  { %v2421_v36 = vsel %vm180_vm3, %v7421_v35, 0.0 }
 0x998   :  { %2422 = vadd.xlane.f32.xlu0 %v2421_v36 }
 0x9a4   :  { %2972 = vrot.lane.b32.xlu1 %v7330_v10, %s6998_s16 }
 0x9ae   :  { %2896 = vrot.lane.b32.xlu0 %v7334_v11, %s6998_s16 }
 0x9bf   :  { %v2405_v41 = vpop.xlane.xlu0 %2404 }
 0x9c0   :  { %6797 = vrcp.f32 %v2405_v41 }
 0x9c3   :  { %v2402_v42 = vpop.xlane.xlu1 %2401 }
 0x9c4   :  { %6799 = vrcp.f32 %v2402_v42 }
 0x9ca   :  { %v6798_v43 = vpop.eup %6797 }
 0x9cb   :  { %v2433_v44 = vmul.f32 %v6798_v43, %v7406_v56 }
 0x9cd   :  { %6422 = vmatmul.mubr.msk.f32.vlgmr.msra.gmra.mrb[28].mxu0 %vm180_vm3, %v2433_v44 }
 0x9ce   :  { %v6800_v45 = vpop.eup %6799  ;;  %6430 = vmatpush3.msra.mxu0 %v2669_v38  ;;  %6431 = vmatprep.mubr.msk.f32.mxu0 %vm6995_vm2, %v6992_v5 }
 0x9cf   :  { %v2432_v10 = vmul.f32 %v6800_v45, %v7410_v58  ;;  %6439 = vmatprep.subr.mxu0 %v6992_v5 }
 0x9d1   :  { %6417 = vmatmul.mubr.msk.f32.vlgmr.msra.gmra.mrb[26].mxu1 %vm180_vm3, %v2432_v10 }
 0x9d2   :  { %6425 = vmatpush3.msra.mxu1 %v2593_v37  ;;  %6426 = vmatprep.mubr.msk.f32.mxu1 %vm6995_vm2, %v6992_v5 }
 0x9d3   :  { %6434 = vmatprep.subr.mxu1 %v6992_v5 }
 0xa18   :  { %v2408_v11 = vpop.xlane.xlu1 %2407 }
 0xa19   :  { %6801 = vrcp.f32 %v2408_v11 }
 0xa1c   :  { %v2414_v7 = vpop.xlane.xlu1 %2413 }
 0xa1d   :  { %6803 = vrcp.f32 %v2414_v7  ;;  %v2411_v46 = vpop.xlane.xlu0 %2410 }
 0xa1e   :  { %6805 = vrcp.f32 %v2411_v46 }
 0xa20   :  { %v2420_v13 = vpop.xlane.xlu1 %2419 }
 0xa21   :  { %6807 = vrcp.f32 %v2420_v13  ;;  %v2417_v14 = vpop.xlane.xlu0 %2416  ;;  %v7001_v13 = vmov 0.0|0.0  }
 0xa22   :  { %6809 = vrcp.f32 %v2417_v14 }
 0xa23   :  { %v6802_v47 = vpop.eup %6801 }
 0xa24   :  { %v2434_v8 = vmul.f32 %v6802_v47, %v6786_v23  ;;  %v2973_v58 = vpop.permute.xlu1 %2972  ;;  %v6676_v23 = vpack.c.bf16 %v3187_v20, %v3186_v19 }
 0xa25   :  { %v2423_v48 = vpop.xlane.xlu0 %2422 }
 0xa26   :  { %6811 = vrcp.f32 %v2423_v48  ;;  %6427 = vmatmul.mubr.msk.f32.vlgmr.msra.gmra.mrb[28].mxu1 %vm180_vm3, %v2434_v8  ;;  %v6048_v8 = vld [vmem:[#allocation7 + $0x50] ss:$0 sm:$0xff] }
 0xa27   :  { %v6804_v49 = vpop.eup %6803  ;;  %6435 = vmatpush3.msra.mxu1 %v2745_v39  ;;  %6436 = vmatprep.mubr.msk.f32.mxu1 %vm6995_vm2, %v6992_v5 }
 0xa28   :  { %v6806_v50 = vpop.eup %6805  ;;  %v2436_v51 = vmul.f32 %v6804_v49, %v6788_v27  ;;  %6444 = vmatprep.subr.mxu1 %v6992_v5  ;;  %v6679_v27 = vpack.c.bf16 %v3189_v25, %v3188_v24 }
 0xa29   :  { %v2435_v52 = vmul.f32 %v6806_v50, %v6790_v28  ;;  %v2897_v53 = vpop.permute.xlu0 %2896 }
 0xa2a   :  { %6437 = vmatmul.mubr.msk.f32.vlgmr.msra.gmra.mrb[30].mxu1 %vm180_vm3, %v2436_v51 }
 0xa2b   :  { %v6808_v54 = vpop.eup %6807  ;;  %6432 = vmatmul.mubr.msk.f32.vlgmr.msra.gmra.mrb[30].mxu0 %vm180_vm3, %v2435_v52  ;;  %6445 = vmatpush3.msra.mxu1 %v2897_v53  ;;  %v6049_v52 = vld [vmem:[#allocation7 + $0x20] ss:$0 sm:$0xff]  ;;  %v6043_v53 = vld [vmem:[#allocation5 + $0x48] ss:$0 sm:$0xff] }
 0xa2c   :  { %v6810_v55 = vpop.eup %6809  ;;  %v2438_v56 = vmul.f32 %v6808_v54, %v6792_v31  ;;  %6440 = vmatpush3.msra.mxu0 %v2821_v40  ;;  %6441 = vmatprep.mubr.msk.f32.mxu0 %vm6995_vm2, %v6992_v5  ;;  %v6731_v31 = vpack.i.bf16 %v3187_v20, %v3186_v19 }
 0xa2d   :  { %v2437_v57 = vmul.f32 %v6810_v55, %v6794_v32  ;;  %6446 = vmatprep.mubr.msk.f32.mxu1 %vm6995_vm2, %v6992_v5  ;;  %6449 = vmatprep.subr.mxu0 %v6992_v5 }
 0xa2e   :  { %6447 = vmatmul.mubr.msk.f32.vlgmr.msra.gmra.mrb[32].mxu1 %vm180_vm3, %v2438_v56  ;;  %6668 = vmatprep.subr.bf16.mxu1 %v6667_v6 }
 0xa2f   :  { %6442 = vmatmul.mubr.msk.f32.vlgmr.msra.gmra.mrb[32].mxu0 %vm180_vm3, %v2437_v57  ;;  %6670 = vmatpush3.bf16.msra.mxu1 %v6667_v6 }
 0xa30   :  { %v6812_v59 = vpop.eup %6811  ;;  %6450 = vmatpush3.msra.mxu0 %v2973_v58  ;;  %6451 = vmatprep.mubr.msk.f32.mxu0 %vm6995_vm2, %v6992_v5 }
 0xa31   :  { %v2439_v60 = vmul.f32 %v6812_v59, %v7421_v35  ;;  %6672 = vmatprep.subr.bf16.mxu1 %v6671_v15  ;;  %v6736_v35 = vpack.i.bf16 %v3189_v25, %v3188_v24  ;;  %6675 = vmatprep.subr.bf16.mxu0 %v7001_v13 }
 0xa33   :  { %6452 = vmatmul.mubr.msk.f32.vlgmr.msra.gmra.mrb[34].mxu0 %vm180_vm3, %v2439_v60  ;;  %6674 = vmatpush3.bf16.msra.mxu1 %v6671_v15  ;;  %v7002_v15 = vmov 1966171168  }
 0xa34   :  { %6473 = vmatprep.mubr.msk.f32.mxu0 %vm6995_vm2, %v6992_v5  ;;  %6677 = vmatpush3.bf16.msra.mxu0 %v6676_v23 }
 0xa35   :  { %6678 = vmatprep.subr.bf16.mxu0 %v7001_v13 }
 0xa38   :  { %6680 = vmatpush3.bf16.msra.mxu0 %v6679_v27 }
 0xa39   :  { %6487 = vmatprep.subr.mxu0 %v6992_v5 }
 0xa3b   :  { %6474 = vmatmul.mubr.msk.f32.vlgmr.msra.gmra.mrb[36].mxu0 %vm1529_vm6, %v6048_v8 }
 0xa3c   :  { %6489 = vmatprep.mubr.msk.f32.mxu0 %vm6995_vm2, %v6992_v5 }
 0xaa0   :  { %v2588_v61 = vpop.f32.mrb[28].mxu0 }
 0xaa1   :  { %v6423_v62 = vpop.f32.mrb[29].mxu0 }
 0xaa4   :  { %v2512_v63 = vpop.f32.mrb[26].mxu1 }
 0xaa5   :  { %v6418_v1 = vpop.f32.mrb[27].mxu1 }
 0xaf9   :  { %v2664_v16 = vpop.f32.mrb[28].mxu1 }
 0xafa   :  { %v6428_v17 = vpop.f32.mrb[29].mxu1  ;;  %3050 = vrot.lane.b32.xlu0 %v2664_v16, %s6990_s10  ;;  %v3376_v16 = vunpack.c.l.s4 %v7002_v15 }
 0xafb   :  { %v3378_v17 = vlaneseq }
 0xafd   :  { %v2816_v18 = vpop.f32.mrb[30].mxu1  ;;  %v7488_v19 = vshrl.u32 %v3378_v17, 7 }
 0xafe   :  { %v2740_v21 = vpop.f32.mrb[30].mxu0  ;;  %3058 = vrot.lane.b32.xlu0 %v2816_v18, %s6999_s17  ;;  %v6438_v22 = vpop.f32.mrb[31].mxu1  ;;  %v3377_v18 = vunpack.c.0.s8 %v3376_v16 }
 0xaff   :  { %3052 = vrot.lane.b32.xlu1 %v2740_v21, %s6990_s10  ;;  %v6433_v26 = vpop.f32.mrb[31].mxu0 }
 0xb00   :  { %v7491_v20 = vsub.s32 %v3377_v18, %v7488_v19 }
 0xb01   :  { %v2968_v28 = vpop.f32.mrb[32].mxu1 }
 0xb02   :  { %v2892_v29 = vpop.f32.mrb[32].mxu0  ;;  %3066 = vrot.lane.b32.xlu0 %v2968_v28, %s7000_s18  ;;  %v6448_v30 = vpop.f32.mrb[33].mxu1 }
 0xb03   :  { %3060 = vrot.lane.b32.xlu1 %v2892_v29, %s6999_s17  ;;  %v6443_v32 = vpop.f32.mrb[33].mxu0 }
 0xb06   :  { %v3044_v33 = vpop.f32.mrb[34].mxu0  ;;  %6732 = vrot.lane.b32.xlu0 %v6731_v31, %s6997_s15 }
 0xb07   :  { %3068 = vrot.lane.b32.xlu1 %v3044_v33, %s7000_s18  ;;  %v6453_v34 = vpop.f32.mrb[35].mxu0 }
 0xb0a   :  { %3290 = vrot.lane.b32.xlu0 %v6049_v52, %s6997_s15 }
 0xb0b   :  { %6737 = vrot.lane.b32.xlu1 %v6736_v35, %s6997_s15 }
 0xb0e   :  { %v3269_v21 = vpop.f32.mrb[36].mxu0 }
 0xb0f   :  { %v7493_v22 = vadd.f32 %v6049_v52, %v3269_v21  ;;  %v6475_v23 = vpop.f32.mrb[37].mxu0 }
 0xb11   :  { %v3381_v24 = vrot.slane %v7493_v22, %v7491_v20 }
 0xb13   :  { %v3382_v25 = vcombine.high %v3381_v24, %v3381_v24  ;;  %v3389_v26 = vrot.slane %v3381_v24, %v7491_v20 }
 0xb15   :  { %v3396_v27 = vrot.slane %v3382_v25, %v7491_v20  ;;  %3397 = vrot.lane.b32.xlu1 %v3389_v26, %s6994_s9 }
 0xb19   :  { %3399 = vrot.lane.b32.xlu1 %v3396_v27, %s6994_s9 }
 0xb6c   :  { %v3051_v36 = vpop.permute.xlu0 %3050 }
 0xb6d   :  { %v3072_v39 = vsel %vm180_vm3, %v2512_v63, %v3051_v36 }
 0xb70   :  { %v3059_v37 = vpop.permute.xlu0 %3058 }
 0xb71   :  { %v3053_v38 = vpop.permute.xlu1 %3052  ;;  %v3074_v40 = vsel %vm1517_vm4, %v3072_v39, %v3059_v37 }
 0xb72   :  { %v3073_v45 = vsel %vm180_vm3, %v2588_v61, %v3053_v38 }
 0xb74   :  { %v3067_v41 = vpop.permute.xlu0 %3066 }
 0xb75   :  { %v3061_v42 = vpop.permute.xlu1 %3060  ;;  %v3076_v43 = vsel %vm1520_vm5, %v3074_v40, %v3067_v41 }
 0xb76   :  { %v3078_v44 = vadd.f32 %v3076_v43, %v7296_v2  ;;  %v3075_v10 = vsel %vm1517_vm4, %v3073_v45, %v3061_v42 }
 0xb78   :  { %6462 = vmatprep.mubr.msk.f32.mxu1 %vm1529_vm6, %v3078_v44  ;;  %v6733_v2 = vpop.permute.xlu0 %6732 }
 0xb79   :  { %v3069_v11 = vpop.permute.xlu1 %3068  ;;  %v6735_v14 = vunpack.i.h.bf16 %v6733_v2  ;;  %v6734_v47 = vunpack.i.l.bf16 %v6733_v2 }
 0xb7a   :  { %v3077_v7 = vsel %vm1520_vm5, %v3075_v10, %v3069_v11 }
 0xb7b   :  { %v3079_v46 = vadd.f32 %v3077_v7, %v7294_v0  ;;  %v6681_v48 = vpack.c.bf16 %v6735_v14, %v6734_v47 }
 0xb7c   :  { %v3291_v28 = vpop.permute.xlu0 %3290 }
 0xb7d   :  { %6463 = vmatmul.mubr.msk.f32.vlgmr.msra.gmra.mrb[34].mxu1 %vm1529_vm6, %v3079_v46  ;;  %v6738_v0 = vpop.permute.xlu1 %6737  ;;  %6682 = vmatprep.subr.bf16.mxu1 %v6681_v48 }
 0xb7e   :  { %v6740_v49 = vunpack.i.h.bf16 %v6738_v0  ;;  %v6739_v50 = vunpack.i.l.bf16 %v6738_v0  ;;  %6684 = vmatpush3.bf16.msra.mxu1 %v6681_v48 }
 0xb80   :  { %v6685_v51 = vpack.c.bf16 %v6740_v49, %v6739_v50 }
 0xb82   :  { %6686 = vmatprep.subr.bf16.mxu1 %v6685_v51 }
 0xb83   :  { %6688 = vmatpush3.bf16.msra.mxu1 %v6685_v51 }
 0xb84   :  { %6497 = vmatprep.subr.mxu1 %v6992_v5 }
 0xb87   :  { %v3398_v33 = vpop.permute.xlu1 %3397 }
 0xb8b   :  { %v3400_v34 = vpop.permute.xlu1 %3399 }
 0xc50   :  { %v6464_v54 = vpop.f32.mrb[34].mxu1 }
 0xc51   :  { %v3162_v55 = vadd.f32 %v6464_v54, %v6043_v53  ;;  %v3156_v56 = vpop.f32.mrb[35].mxu1 }
 0xc52   :  { %v3157_v57 = vadd.f32 %v6043_v53, %v3156_v56 }
 0xc53   :  { %v6047_v58 = vmul.f32 -1.442695, %v3162_v55 }
 0xc54   :  { %v6046_v59 = vmul.f32 -1.442695, %v3157_v57 }
 0xc55   :  { %6813 = vpow2.f32 %v6047_v58 }
 0xc56   :  { %6815 = vpow2.f32 %v6046_v59 }
 0xc5f   :  { %v6814_v60 = vpop.eup %6813 }
 0xc60   :  { %v6816_v61 = vpop.eup %6815  ;;  %v3172_v62 = vadd.f32 1.0, %v6814_v60 }
 0xc61   :  { %v3171_v63 = vadd.f32 1.0, %v6816_v61 }
 0xc62   :  { %6817 = vrcp.f32 %v3172_v62 }
 0xc63   :  { %6819 = vrcp.f32 %v3171_v63 }
 0xc6c   :  { %v6818_v1 = vpop.eup %6817 }
 0xc6d   :  { %v6820_v3 = vpop.eup %6819  ;;  %v3178_v4 = vmul.f32 %v6818_v1, %v3162_v55 }
 0xc6e   :  { %v3177_v6 = vmul.f32 %v6820_v3, %v3157_v57 }
 0xc6f   :  { %v3180_v12 = vadd.f32 %v3178_v4, %v3079_v46 }
 0xc70   :  { %v3179_v9 = vadd.f32 %v3177_v6, %v3078_v44 }
 0xc72   :  { %6484 = vmatprep.mubr.msk.f32.mxu1 %vm1529_vm6, %v3179_v9 }
 0xc73   :  { %6485 = vmatmul.mubr.msk.f32.vlgmr.msra.gmra.mrb[36].mxu1 %vm1529_vm6, %v3180_v12 }
 0xc74   :  { %6499 = vmatprep.mubr.msk.f32.mxu1 %vm6995_vm2, %v6992_v5 }
 0xd46   :  { %v6486_v29 = vpop.f32.mrb[36].mxu1 }
 0xd47   :  { %v7501_v30 = vadd.f32 %v6486_v29, %v3291_v28  ;;  %v3365_v31 = vpop.f32.mrb[37].mxu1 }
 0xd48   :  { %v7503_v32 = vadd.f32 %v3365_v31, %v3291_v28 }
 0xd49   :  { %3417 = vrot.lane.b32.xlu0 %v7501_v30, %s6993_s3  ;;  %3413 = vrot.lane.b32.xlu1 %v7501_v30, %s6994_s9 }
 0xd4a   :  { %6488 = vmatpush3.xpose.msk.msra.mxu0 %vm180_vm3, %v7503_v32 }
 0xd4b   :  { %6492 = vmatprep.subr.mxu0 %v6992_v5 }
 0xd4d   :  { %3421 = vrot.lane.b32.xlu0 %v7501_v30, %s6996_s0  ;;  %3403 = vrot.lane.b32.xlu1 %v3396_v27, %s6993_s3 }
 0xd4e   :  { %6490 = vmatmul.mubr.msk.f32.vlgmr.msra.gmra.mrb[38].mxu0 %vm180_vm3, %v3389_v26 }
 0xd4f   :  { %6493 = vmatpush3.xpose.msk.msra.mxu0 %vm180_vm3, %v7501_v30  ;;  %6494 = vmatprep.mubr.msk.f32.mxu0 %vm6995_vm2, %v6992_v5 }
 0xd50   :  { %6502 = vmatprep.subr.mxu0 %v6992_v5 }
 0xd51   :  { %3401 = vrot.lane.b32.xlu1 %v3389_v26, %s6993_s3  ;;  %3411 = vrot.lane.b32.xlu0 %v7503_v32, %s6994_s9 }
 0xd52   :  { %6495 = vmatmul.mubr.msk.f32.vlgmr.msra.gmra.mrb[40].mxu0 %vm180_vm3, %v3396_v27 }
 0xd53   :  { %6504 = vmatprep.mubr.msk.f32.mxu0 %vm6995_vm2, %v6992_v5 }
 0xd55   :  { %3407 = vrot.lane.b32.xlu1 %v3396_v27, %s6996_s0  ;;  %3415 = vrot.lane.b32.xlu0 %v7503_v32, %s6993_s3 }
 0xd59   :  { %3419 = vrot.lane.b32.xlu0 %v7503_v32, %s6996_s0 }
 0xd5d   :  { %3405 = vrot.lane.b32.xlu0 %v3389_v26, %s6996_s0 }
 0xdbb   :  { %v7533_v35 = vpop.permute.xlu0 %3417  ;;  %v7535_v36 = vpop.permute.xlu1 %3413 }
 0xdbc   :  { %6503 = vmatpush3.xpose.msk.msra.mxu0 %vm180_vm3, %v7535_v36 }
 0xdbd   :  { %6512 = vmatprep.subr.mxu0 %v6992_v5 }
 0xdbf   :  { %v7540_v37 = vpop.permute.xlu0 %3421  ;;  %v3404_v38 = vpop.permute.xlu1 %3403  ;;  %6505 = vmatmul.mubr.msk.f32.vlgmr.msra.gmra.mrb[42].mxu0 %vm180_vm3, %v3400_v34 }
 0xdc0   :  { %6513 = vmatpush3.xpose.msk.msra.mxu0 %vm180_vm3, %v7533_v35  ;;  %6514 = vmatprep.mubr.msk.f32.mxu0 %vm6995_vm2, %v6992_v5 }
 0xdc1   :  { %6522 = vmatprep.subr.mxu0 %v6992_v5 }
 0xdc3   :  { %v3402_v39 = vpop.permute.xlu1 %3401  ;;  %v7548_v40 = vpop.permute.xlu0 %3411  ;;  %6515 = vmatmul.mubr.msk.f32.vlgmr.msra.gmra.mrb[44].mxu0 %vm180_vm3, %v3404_v38 }
 0xdc4   :  { %6498 = vmatpush3.xpose.msk.msra.mxu1 %vm180_vm3, %v7548_v40  ;;  %6523 = vmatpush3.xpose.msk.msra.mxu0 %vm180_vm3, %v7540_v37 }
 0xdc5   :  { %6507 = vmatprep.subr.mxu1 %v6992_v5  ;;  %6524 = vmatprep.mubr.msk.f32.mxu0 %vm6995_vm2, %v6992_v5 }
 0xdc6   :  { %6532 = vmatprep.subr.mxu0 %v6992_v5 }
 0xdc7   :  { %v3408_v41 = vpop.permute.xlu1 %3407  ;;  %6500 = vmatmul.mubr.msk.f32.vlgmr.msra.gmra.mrb[38].mxu1 %vm180_vm3, %v3398_v33  ;;  %v3416_v42 = vpop.permute.xlu0 %3415 }
 0xdc8   :  { %6508 = vmatpush3.xpose.msk.msra.mxu1 %vm180_vm3, %v3416_v42  ;;  %6525 = vmatmul.mubr.msk.f32.vlgmr.msra.gmra.mrb[46].mxu0 %vm180_vm3, %v3408_v41 }
 0xdc9   :  { %6509 = vmatprep.mubr.msk.f32.mxu1 %vm6995_vm2, %v6992_v5  ;;  %6517 = vmatprep.subr.mxu1 %v6992_v5 }
 0xdca   :  { %6534 = vmatprep.mubr.msk.f32.mxu0 %vm6995_vm2, %v6992_v5 }
 0xdcb   :  { %6510 = vmatmul.mubr.msk.f32.vlgmr.msra.gmra.mrb[40].mxu1 %vm180_vm3, %v3402_v39  ;;  %v7568_v43 = vpop.permute.xlu0 %3419 }
 0xdcc   :  { %6518 = vmatpush3.xpose.msk.msra.mxu1 %vm180_vm3, %v7568_v43  ;;  %6519 = vmatprep.mubr.msk.f32.mxu1 %vm6995_vm2, %v6992_v5 }
 0xdcd   :  { %6527 = vmatprep.subr.mxu1 %v6992_v5 }
 0xdcf   :  { %v3406_v44 = vpop.permute.xlu0 %3405 }
 0xdd0   :  { %6520 = vmatmul.mubr.msk.f32.vlgmr.msra.gmra.mrb[42].mxu1 %vm180_vm3, %v3406_v44 }
 0xdd1   :  { %6529 = vmatprep.mubr.msk.f32.mxu1 %vm6995_vm2, %v6992_v5 }
 0xe21   :  { %v3493_v45 = vpop.f32.mrb[38].mxu0 }
 0xe22   :  { %v4015_v10 = vmul.f32 0.17677669, %v3493_v45  ;;  %v6491_v11 = vpop.f32.mrb[39].mxu0 }
 0xe24   :  { %v4024_v7 = vsel %vm4023_vm7, %v4015_v10, -inf }
 0xe25   :  { %4025 = vmax.xlane.f32.xlu0 %v4024_v7  ;;  %v3567_v46 = vpop.f32.mrb[40].mxu0 }
 0xe26   :  { %v4016_v2 = vmul.f32 0.17677669, %v3567_v46  ;;  %v6496_v14 = vpop.f32.mrb[41].mxu0 }
 0xe28   :  { %v4027_v47 = vsel %vm4023_vm7, %v4016_v2, -inf }
 0xe29   :  { %4028 = vmax.xlane.f32.xlu1 %v4027_v47 }
 0xe92   :  { %v3715_v8 = vpop.f32.mrb[42].mxu0 }
 0xe93   :  { %v4018_v48 = vmul.f32 0.17677669, %v3715_v8  ;;  %v6506_v0 = vpop.f32.mrb[43].mxu0 }
 0xe95   :  { %v4033_v49 = vsel %vm4023_vm7, %v4018_v48, -inf }
 0xe96   :  { %4034 = vmax.xlane.f32.xlu0 %v4033_v49  ;;  %v3863_v50 = vpop.f32.mrb[44].mxu0 }
 0xe97   :  { %v4020_v51 = vmul.f32 0.17677669, %v3863_v50  ;;  %v6516_v52 = vpop.f32.mrb[45].mxu0 }
 0xe99   :  { %v4039_v53 = vsel %vm4023_vm7, %v4020_v51, -inf }
 0xe9a   :  { %v3641_v54 = vpop.f32.mrb[38].mxu1  ;;  %4040 = vmax.xlane.f32.xlu0 %v4039_v53 }
 0xe9b   :  { %v4017_v55 = vmul.f32 0.17677669, %v3641_v54  ;;  %v6501_v56 = vpop.f32.mrb[39].mxu1  ;;  %v4011_v57 = vpop.f32.mrb[46].mxu0 }
 0xe9c   :  { %v4022_v58 = vmul.f32 0.17677669, %v4011_v57  ;;  %v6526_v59 = vpop.f32.mrb[47].mxu0 }
 0xe9d   :  { %v4030_v60 = vsel %vm4023_vm7, %v4017_v55, -inf }
 0xe9e   :  { %v3789_v61 = vpop.f32.mrb[40].mxu1  ;;  %4031 = vmax.xlane.f32.xlu1 %v4030_v60  ;;  %v4045_v62 = vsel %vm4023_vm7, %v4022_v58, -inf }
 0xe9f   :  { %v4019_v63 = vmul.f32 0.17677669, %v3789_v61  ;;  %v6511_v1 = vpop.f32.mrb[41].mxu1  ;;  %4046 = vmax.xlane.f32.xlu0 %v4045_v62 }
 0xea1   :  { %v4036_v3 = vsel %vm4023_vm7, %v4019_v63, -inf }
 0xea2   :  { %4037 = vmax.xlane.f32.xlu1 %v4036_v3 }
 0xea3   :  { %v3937_v4 = vpop.f32.mrb[42].mxu1 }
 0xea4   :  { %v4021_v6 = vmul.f32 0.17677669, %v3937_v4  ;;  %v6521_v9 = vpop.f32.mrb[43].mxu1 }
 0xea6   :  { %v4042_v12 = vsel %vm4023_vm7, %v4021_v6, -inf }
 0xea7   :  { %4043 = vmax.xlane.f32.xlu1 %v4042_v12 }
 0xeb2   :  { %v4026_v18 = vpop.xlane.xlu0 %4025 }
 0xeb3   :  { %v4048_v21 = vsub.f32 %v4015_v10, %v4026_v18 }
 0xeb5   :  { %4188 = vrot.lane.b32.xlu0 %v7501_v30, %s6997_s15  ;;  %v4056_v23 = vmul.f32 1.442695, %v4048_v21 }
 0xeb6   :  { %v4029_v15 = vpop.xlane.xlu1 %4028 }
 0xeb7   :  { %v4049_v16 = vsub.f32 %v4016_v2, %v4029_v15 }
 0xeb8   :  { %4112 = vrot.lane.b32.xlu1 %v7503_v32, %s6997_s15 }
 0xeb9   :  { %4264 = vrot.lane.b32.xlu0 %v7548_v40, %s6997_s15  ;;  %v4058_v17 = vmul.f32 1.442695, %v4049_v16 }
 0xebb   :  { %6821 = vpow2.f32 %v4058_v17 }
 0xebc   :  { %4340 = vrot.lane.b32.xlu1 %v7535_v36, %s6997_s15  ;;  %6823 = vpow2.f32 %v4056_v23 }
 0xebd   :  { %4416 = vrot.lane.b32.xlu0 %v3416_v42, %s6997_s15 }
 0xec0   :  { %4492 = vrot.lane.b32.xlu1 %v7533_v35, %s6997_s15 }
 0xec5   :  { %v7597_v24 = vpop.eup %6821 }
 0xec6   :  { %v4075_v25 = vsel %vm4023_vm7, %v7597_v24, 0.0  ;;  %v7601_v26 = vpop.eup %6823 }
 0xec7   :  { %v4072_v27 = vsel %vm4023_vm7, %v7601_v26, 0.0 }
 0xedc   :  { %4076 = vadd.xlane.f32.xlu0 %v4075_v25 }
 0xee4   :  { %4073 = vadd.xlane.f32.xlu1 %v4072_v27 }
 0xf23   :  { %v4035_v28 = vpop.xlane.xlu0 %4034 }
 0xf24   :  { %v4051_v29 = vsub.f32 %v4018_v48, %v4035_v28 }
 0xf26   :  { %v4062_v30 = vmul.f32 1.442695, %v4051_v29 }
 0xf27   :  { %v4041_v31 = vpop.xlane.xlu0 %4040 }
 0xf28   :  { %6825 = vpow2.f32 %v4062_v30  ;;  %v4053_v32 = vsub.f32 %v4020_v51, %v4041_v31 }
 0xf2a   :  { %v4066_v33 = vmul.f32 1.442695, %v4053_v32 }
 0xf2b   :  { %v4032_v34 = vpop.xlane.xlu1 %4031 }
 0xf2c   :  { %6827 = vpow2.f32 %v4066_v33  ;;  %v4050_v35 = vsub.f32 %v4017_v55, %v4032_v34  ;;  %v4047_v36 = vpop.xlane.xlu0 %4046 }
 0xf2d   :  { %v4055_v38 = vsub.f32 %v4022_v58, %v4047_v36  ;;  %v3191_v36 = vld [vmem:[#allocation7 + $0x28] sm:$0xff] }
 0xf2e   :  { %v4060_v39 = vmul.f32 1.442695, %v4050_v35 }
 0xf2f   :  { %v4070_v40 = vmul.f32 1.442695, %v4055_v38  ;;  %v4038_v41 = vpop.xlane.xlu1 %4037  ;;  %v3192_v38 = vld [vmem:[#allocation7 + $0x30] sm:$0xff] }
 0xf30   :  { %6829 = vpow2.f32 %v4060_v39  ;;  %v4052_v42 = vsub.f32 %v4019_v63, %v4038_v41  ;;  %v4189_v44 = vpop.permute.xlu0 %4188 }
 0xf31   :  { %6831 = vpow2.f32 %v4070_v40  ;;  %6533 = vmatpush3.msra.mxu0 %v4189_v44  ;;  %v6690_v40 = vpack.c.bf16 %v3192_v38, %v3191_v36  ;;  %v3194_v44 = vld [vmem:[#allocation7 + $0x40] sm:$0xff] }
 0xf32   :  { %v6826_v45 = vpop.eup %6825  ;;  %v4064_v10 = vmul.f32 1.442695, %v4052_v42  ;;  %6542 = vmatprep.subr.mxu0 %v6992_v5  ;;  %v3193_v42 = vld [vmem:[#allocation7 + $0x38] sm:$0xff] }
 0xf33   :  { %v4081_v11 = vsel %vm4023_vm7, %v6826_v45, 0.0 }
 0xf34   :  { %6833 = vpow2.f32 %v4064_v10  ;;  %v4044_v7 = vpop.xlane.xlu1 %4043  ;;  %4082 = vadd.xlane.f32.xlu0 %v4081_v11  ;;  %v4265_v55 = vpop.permute.xlu0 %4264  ;;  %v6693_v10 = vpack.c.bf16 %v3194_v44, %v3193_v42 }
 0xf35   :  { %v4054_v46 = vsub.f32 %v4021_v6, %v4044_v7 }
 0xf36   :  { %v6828_v2 = vpop.eup %6827 }
 0xf37   :  { %v4068_v14 = vmul.f32 1.442695, %v4054_v46  ;;  %v4087_v47 = vsel %vm4023_vm7, %v6828_v2, 0.0 }
 0xf38   :  { %v4113_v8 = vpop.permute.xlu1 %4112  ;;  %4088 = vadd.xlane.f32.xlu0 %v4087_v47  ;;  %v4417_v56 = vpop.permute.xlu0 %4416 }
 0xf39   :  { %6835 = vpow2.f32 %v4068_v14  ;;  %6528 = vmatpush3.msra.mxu1 %v4113_v8 }
 0xf3a   :  { %v6830_v48 = vpop.eup %6829  ;;  %6537 = vmatprep.subr.mxu1 %v6992_v5 }
 0xf3b   :  { %v6832_v0 = vpop.eup %6831  ;;  %v4078_v49 = vsel %vm4023_vm7, %v6830_v48, 0.0 }
 0xf3c   :  { %4079 = vadd.xlane.f32.xlu1 %v4078_v49  ;;  %v4093_v50 = vsel %vm4023_vm7, %v6832_v0, 0.0  ;;  %v4341_v57 = vpop.permute.xlu1 %4340 }
 0xf3d   :  { %4094 = vadd.xlane.f32.xlu0 %v4093_v50 }
 0xf3e   :  { %v6834_v51 = vpop.eup %6833 }
 0xf3f   :  { %v4084_v52 = vsel %vm4023_vm7, %v6834_v51, 0.0 }
 0xf40   :  { %4085 = vadd.xlane.f32.xlu1 %v4084_v52  ;;  %v4493_v59 = vpop.permute.xlu1 %4492 }
 0xf43   :  { %v7612_v53 = vpop.eup %6835 }
 0xf44   :  { %v4090_v54 = vsel %vm4023_vm7, %v7612_v53, 0.0 }
 0xf45   :  { %4091 = vadd.xlane.f32.xlu1 %v4090_v54 }
 0xf53   :  { %4568 = vrot.lane.b32.xlu0 %v7568_v43, %s6997_s15 }
 0xf56   :  { %4644 = vrot.lane.b32.xlu1 %v7540_v37, %s6997_s15 }
 0xf69   :  { %v4077_v58 = vpop.xlane.xlu0 %4076 }
 0xf6a   :  { %6837 = vrcp.f32 %v4077_v58 }
 0xf71   :  { %v4074_v60 = vpop.xlane.xlu1 %4073 }
 0xf72   :  { %6839 = vrcp.f32 %v4074_v60 }
 0xf74   :  { %v6838_v61 = vpop.eup %6837 }
 0xf75   :  { %v4105_v62 = vmul.f32 %v6838_v61, %v7597_v24 }
 0xf77   :  { %6535 = vmatmul.mubr.msk.f32.vlgmr.msra.gmra.mrb[48].mxu0 %vm180_vm3, %v4105_v62 }
 0xf78   :  { %6543 = vmatpush3.msra.mxu0 %v4341_v57  ;;  %6544 = vmatprep.mubr.msk.f32.mxu0 %vm6995_vm2, %v6992_v5 }
 0xf79   :  { %6552 = vmatprep.subr.mxu0 %v6992_v5 }
 0xf7c   :  { %v6840_v37 = vpop.eup %6839 }
 0xf7d   :  { %v4104_v43 = vmul.f32 %v6840_v37, %v7601_v26  ;;  %v4842_v37 = vld [vmem:[%s7838_s4] sm:$0xff] }
 0xf7f   :  { %6530 = vmatmul.mubr.msk.f32.vlgmr.msra.gmra.mrb[44].mxu1 %vm180_vm3, %v4104_v43  ;;  %v4843_v43 = vld [vmem:[%s7838_s4 + $0x8] sm:$0xff] }
 0xf80   :  { %6538 = vmatpush3.msra.mxu1 %v4265_v55  ;;  %6539 = vmatprep.mubr.msk.f32.mxu1 %vm6995_vm2, %v6992_v5 }
 0xf81   :  { %6547 = vmatprep.subr.mxu1 %v6992_v5 }
 0xfc1   :  { %v4083_v63 = vpop.xlane.xlu0 %4082 }
 0xfc2   :  { %6841 = vrcp.f32 %v4083_v63  ;;  %v6696_v63 = vpack.c.bf16 %v4843_v43, %v4842_v37 }
 0xfc5   :  { %v4089_v1 = vpop.xlane.xlu0 %4088 }
 0xfc6   :  { %6843 = vrcp.f32 %v4089_v1  ;;  %v4845_v1 = vld [vmem:[%s7838_s4 + $0x18] sm:$0xff] }
 0xfc9   :  { %v4080_v3 = vpop.xlane.xlu1 %4079 }
 0xfca   :  { %6845 = vrcp.f32 %v4080_v3  ;;  %v4095_v4 = vpop.xlane.xlu0 %4094 }
 0xfcb   :  { %6847 = vrcp.f32 %v4095_v4  ;;  %v6077_v4 = vld [vmem:[#allocation7 + $0x48] ss:$0 sm:$0xff] }
 0xfcc   :  { %v6842_v6 = vpop.eup %6841 }
 0xfcd   :  { %v4107_v9 = vmul.f32 %v6842_v6, %v6826_v45  ;;  %v4086_v12 = vpop.xlane.xlu1 %4085 }
 0xfce   :  { %6849 = vrcp.f32 %v4086_v12  ;;  %v4569_v28 = vpop.permute.xlu0 %4568 }
 0xfcf   :  { %6545 = vmatmul.mubr.msk.f32.vlgmr.msra.gmra.mrb[50].mxu0 %vm180_vm3, %v4107_v9 }
 0xfd0   :  { %v6844_v15 = vpop.eup %6843  ;;  %6553 = vmatpush3.msra.mxu0 %v4493_v59  ;;  %6554 = vmatprep.mubr.msk.f32.mxu0 %vm6995_vm2, %v6992_v5 }
 0xfd1   :  { %v4109_v16 = vmul.f32 %v6844_v15, %v6828_v2  ;;  %6562 = vmatprep.subr.mxu0 %v6992_v5 }
 0xfd2   :  { %v4092_v17 = vpop.xlane.xlu1 %4091 }
 0xfd3   :  { %6851 = vrcp.f32 %v4092_v17  ;;  %6555 = vmatmul.mubr.msk.f32.vlgmr.msra.gmra.mrb[52].mxu0 %vm180_vm3, %v4109_v16 }
 0xfd4   :  { %v6846_v18 = vpop.eup %6845  ;;  %6564 = vmatprep.mubr.msk.f32.mxu0 %vm6995_vm2, %v6992_v5 }
 0xfd5   :  { %v6848_v21 = vpop.eup %6847  ;;  %v4106_v23 = vmul.f32 %v6846_v18, %v6830_v48 }
 0xfd6   :  { %v4111_v24 = vmul.f32 %v6848_v21, %v6832_v0  ;;  %v4645_v25 = vpop.permute.xlu1 %4644 }
 0xfd7   :  { %6540 = vmatmul.mubr.msk.f32.vlgmr.msra.gmra.mrb[46].mxu1 %vm180_vm3, %v4106_v23  ;;  %6563 = vmatpush3.msra.mxu0 %v4645_v25 }
 0xfd8   :  { %v6850_v26 = vpop.eup %6849  ;;  %6548 = vmatpush3.msra.mxu1 %v4417_v56  ;;  %6565 = vmatmul.mubr.msk.f32.vlgmr.msra.gmra.mrb[54].mxu0 %vm180_vm3, %v4111_v24  ;;  %v6080_v24 = vld [vmem:[%s7838_s4 + $0x20] ss:$0 sm:$0xff] }
 0xfd9   :  { %v4108_v27 = vmul.f32 %v6850_v26, %v6834_v51  ;;  %6549 = vmatprep.mubr.msk.f32.mxu1 %vm6995_vm2, %v6992_v5  ;;  %6557 = vmatprep.subr.mxu1 %v6992_v5 }
 0xfda   :  { %6695 = vmatprep.subr.bf16.mxu0 %v7001_v13  ;;  %6586 = vmatprep.mubr.msk.f32.mxu0 %vm6995_vm2, %v6992_v5 }
 0xfdb   :  { %6550 = vmatmul.mubr.msk.f32.vlgmr.msra.gmra.mrb[48].mxu1 %vm180_vm3, %v4108_v27  ;;  %6697 = vmatpush3.bf16.msra.mxu0 %v6696_v63 }
 0xfdc   :  { %6558 = vmatpush3.msra.mxu1 %v4569_v28  ;;  %6559 = vmatprep.mubr.msk.f32.mxu1 %vm6995_vm2, %v6992_v5 }
 0xfdd   :  { %v6852_v29 = vpop.eup %6851  ;;  %6689 = vmatprep.subr.bf16.mxu1 %v7001_v13  ;;  %6698 = vmatprep.subr.bf16.mxu0 %v7001_v13 }
 0xfde   :  { %v4110_v30 = vmul.f32 %v6852_v29, %v7612_v53 }
 0xfe0   :  { %6560 = vmatmul.mubr.msk.f32.vlgmr.msra.gmra.mrb[50].mxu1 %vm180_vm3, %v4110_v30 }
 0xfe1   :  { %6575 = vmatprep.mubr.msk.f32.mxu1 %vm6995_vm2, %v6992_v5  ;;  %6691 = vmatpush3.bf16.msra.mxu1 %v6690_v40 }
 0xfe2   :  { %6692 = vmatprep.subr.bf16.mxu1 %v7001_v13 }
 0xfe5   :  { %6694 = vmatpush3.bf16.msra.mxu1 %v6693_v10 }
 0xfe6   :  { %6589 = vmatprep.subr.mxu1 %v6992_v5 }
0x104a   :  { %v4260_v31 = vpop.f32.mrb[48].mxu0 }
0x104b   :  { %v6536_v32 = vpop.f32.mrb[49].mxu0 }
0x1052   :  { %v4184_v33 = vpop.f32.mrb[44].mxu1 }
0x1053   :  { %v6531_v34 = vpop.f32.mrb[45].mxu1 }
0x10a2   :  { %v4412_v35 = vpop.f32.mrb[50].mxu0 }
0x10a3   :  { %4724 = vrot.lane.b32.xlu1 %v4412_v35, %s6990_s10  ;;  %v6546_v39 = vpop.f32.mrb[51].mxu0 }
0x10a6   :  { %v4564_v41 = vpop.f32.mrb[52].mxu0 }
0x10a7   :  { %4732 = vrot.lane.b32.xlu0 %v4564_v41, %s6999_s17  ;;  %v6556_v45 = vpop.f32.mrb[53].mxu0 }
0x10aa   :  { %v4336_v11 = vpop.f32.mrb[46].mxu1 }
0x10ab   :  { %v6541_v7 = vpop.f32.mrb[47].mxu1  ;;  %4722 = vrot.lane.b32.xlu1 %v4336_v11, %s6990_s10  ;;  %v4716_v46 = vpop.f32.mrb[54].mxu0 }
0x10ac   :  { %4740 = vrot.lane.b32.xlu0 %v4716_v46, %s7000_s18  ;;  %v6566_v2 = vpop.f32.mrb[55].mxu0 }
0x10ae   :  { %v4488_v14 = vpop.f32.mrb[48].mxu1 }
0x10af   :  { %v6551_v47 = vpop.f32.mrb[49].mxu1  ;;  %4730 = vrot.lane.b32.xlu1 %v4488_v14, %s6999_s17 }
0x10b3   :  { %v4640_v8 = vpop.f32.mrb[50].mxu1 }
0x10b4   :  { %v6561_v48 = vpop.f32.mrb[51].mxu1  ;;  %4738 = vrot.lane.b32.xlu0 %v4640_v8, %s7000_s18 }
0x1115   :  { %v4725_v0 = vpop.permute.xlu1 %4724 }
0x1116   :  { %v4745_v52 = vsel %vm180_vm3, %v4260_v31, %v4725_v0 }
0x1119   :  { %v4733_v49 = vpop.permute.xlu0 %4732 }
0x111a   :  { %v4747_v53 = vsel %vm1517_vm4, %v4745_v52, %v4733_v49 }
0x111d   :  { %v4723_v50 = vpop.permute.xlu1 %4722 }
0x111e   :  { %v4741_v51 = vpop.permute.xlu0 %4740  ;;  %v4744_v56 = vsel %vm180_vm3, %v4184_v33, %v4723_v50 }
0x111f   :  { %v4749_v54 = vsel %vm1520_vm5, %v4747_v53, %v4741_v51 }
0x1120   :  { %v4752_v57 = vrot.slane %v4749_v54, 7 }
0x1121   :  { %v4731_v55 = vpop.permute.xlu1 %4730 }
0x1122   :  { %v4746_v58 = vsel %vm1517_vm4, %v4744_v56, %v4731_v55 }
0x1126   :  { %v4739_v59 = vpop.permute.xlu0 %4738 }
0x1127   :  { %v4748_v60 = vsel %vm1520_vm5, %v4746_v58, %v4739_v59 }
0x1128   :  { %v4754_v61 = vsel %vm4753_vm8, %v4752_v57, %v4748_v60  ;;  %v5086_v57 = vsub.s32 0, %v7488_v19 }
0x1129   :  { %v4756_v62 = vadd.f32 %v4754_v61, %v7493_v22  ;;  %v4844_v22 = vld [vmem:[%s7838_s4 + $0x10] sm:$0xff] }
0x112a   :  { %v6699_v3 = vpack.c.bf16 %v4845_v1, %v4844_v22 }
0x112b   :  { %6576 = vmatmul.mubr.msk.f32.vlgmr.msra.gmra.mrb[52].mxu1 %vm1529_vm6, %v4756_v62 }
0x112c   :  { %6591 = vmatprep.mubr.msk.f32.mxu1 %vm6995_vm2, %v6992_v5  ;;  %6700 = vmatpush3.bf16.msra.mxu0 %v6699_v3 }
0x112d   :  { %6594 = vmatprep.subr.mxu0 %v6992_v5 }
0x11fe   :  { %v4830_v6 = vpop.f32.mrb[52].mxu1 }
0x11ff   :  { %v4831_v9 = vadd.f32 %v6077_v4, %v4830_v6  ;;  %v6577_v12 = vpop.f32.mrb[53].mxu1 }
0x1201   :  { %v6079_v15 = vmul.f32 -1.442695, %v4831_v9 }
0x1203   :  { %6853 = vpow2.f32 %v6079_v15 }
0x120d   :  { %v6854_v16 = vpop.eup %6853 }
0x120e   :  { %v4837_v17 = vadd.f32 1.0, %v6854_v16 }
0x1210   :  { %6855 = vrcp.f32 %v4837_v17 }
0x121a   :  { %v6856_v18 = vpop.eup %6855 }
0x121b   :  { %v4840_v21 = vmul.f32 %v6856_v18, %v4831_v9 }
0x121d   :  { %v4841_v23 = vadd.f32 %v4840_v21, %v4756_v62 }
0x121f   :  { %6587 = vmatmul.mubr.msk.f32.vlgmr.msra.gmra.mrb[56].mxu0 %vm1529_vm6, %v4841_v23 }
0x1220   :  { %6596 = vmatprep.mubr.msk.f32.mxu0 %vm6995_vm2, %v6992_v5 }
0x12f2   :  { %v4925_v25 = vpop.f32.mrb[56].mxu0 }
0x12f3   :  { %v7692_v26 = vadd.f32 %v6080_v24, %v4925_v25  ;;  %v6588_v27 = vpop.f32.mrb[57].mxu0 }
0x12f5   :  { %v4936_v28 = vrot.slane %v7692_v26, %v7491_v20 }
0x12f7   :  { %v4937_v29 = vcombine.high %v4936_v28, %v4936_v28  ;;  %v4944_v30 = vrot.slane %v4936_v28, %v7491_v20 }
0x12f9   :  { %v4951_v31 = vrot.slane %v4937_v29, %v7491_v20  ;;  %4954 = vrot.lane.b32.xlu0 %v4944_v30, %s6994_s9  ;;  %v5087_v58 = vrot.slane %v4944_v30, %v5086_v57 }
0x12fb   :  { %4956 = vrot.lane.b32.xlu1 %v4951_v31, %s6994_s9  ;;  %v5170_v60 = vrot.slane %v4951_v31, %v5086_v57 }
0x12fd   :  { %4960 = vrot.lane.b32.xlu0 %v4944_v30, %s6993_s3 }
0x12ff   :  { %4962 = vrot.lane.b32.xlu1 %v4951_v31, %s6993_s3 }
0x1301   :  { %4966 = vrot.lane.b32.xlu0 %v4944_v30, %s6996_s0 }
0x1303   :  { %4968 = vrot.lane.b32.xlu1 %v4951_v31, %s6996_s0 }
0x1305   :  { %4972 = vrot.lane.b32.xlu0 %v4944_v30, %s6997_s15 }
0x1307   :  { %4979 = vrot.lane.b32.xlu1 %v4951_v31, %s6997_s15 }
0x136b   :  { %v4955_v32 = vpop.permute.xlu0 %4954 }
0x136c   :  { %4986 = vrot.lane.b32.xlu0 %v4955_v32, %s6997_s15  ;;  %v5251_v62 = vrot.slane %v4955_v32, %v5086_v57 }
0x136d   :  { %v4957_v33 = vpop.permute.xlu1 %4956 }
0x136e   :  { %4993 = vrot.lane.b32.xlu1 %v4957_v33, %s6997_s15  ;;  %v5332_v59 = vrot.slane %v4957_v33, %v5086_v57 }
0x136f   :  { %v4961_v34 = vpop.permute.xlu0 %4960 }
0x1370   :  { %5000 = vrot.lane.b32.xlu0 %v4961_v34, %s6997_s15  ;;  %v5413_v43 = vrot.slane %v4961_v34, %v5086_v57 }
0x1371   :  { %v4963_v35 = vpop.permute.xlu1 %4962 }
0x1372   :  { %5007 = vrot.lane.b32.xlu1 %v4963_v35, %s6997_s15  ;;  %v5494_v61 = vrot.slane %v4963_v35, %v5086_v57 }
0x1373   :  { %v4967_v36 = vpop.permute.xlu0 %4966 }
0x1374   :  { %5014 = vrot.lane.b32.xlu0 %v4967_v36, %s6997_s15  ;;  %v5575_v19 = vrot.slane %v4967_v36, %v5086_v57 }
0x1375   :  { %v4969_v38 = vpop.permute.xlu1 %4968 }
0x1376   :  { %5021 = vrot.lane.b32.xlu1 %v4969_v38, %s6997_s15  ;;  %v5656_v37 = vrot.slane %v4969_v38, %v5086_v57 }
0x1377   :  { %v4973_v39 = vpop.permute.xlu0 %4972 }
0x1378   :  { %v4975_v40 = vmul.f32 %v4973_v39, %v4944_v30 }
0x1379   :  { %v4980_v41 = vpop.permute.xlu1 %4979 }
0x137a   :  { %v4976_v42 = vsel %vm4023_vm7, %v4975_v40, 0.0  ;;  %v4982_v44 = vmul.f32 %v4980_v41, %v4951_v31 }
0x137c   :  { %v4983_v45 = vsel %vm4023_vm7, %v4982_v44, 0.0 }
0x1393   :  { %4977 = vadd.xlane.f32.xlu0 %v4976_v42 }
0x139a   :  { %4984 = vadd.xlane.f32.xlu1 %v4983_v45 }
0x13de   :  { %v4987_v10 = vpop.permute.xlu0 %4986 }
0x13df   :  { %v4989_v11 = vmul.f32 %v4987_v10, %v4955_v32 }
0x13e0   :  { %v4994_v7 = vpop.permute.xlu1 %4993 }
0x13e1   :  { %v4996_v46 = vmul.f32 %v4994_v7, %v4957_v33  ;;  %v4990_v2 = vsel %vm4023_vm7, %v4989_v11, 0.0 }
0x13e2   :  { %v5001_v14 = vpop.permute.xlu0 %5000  ;;  %4991 = vadd.xlane.f32.xlu1 %v4990_v2 }
0x13e3   :  { %v5003_v47 = vmul.f32 %v5001_v14, %v4961_v34  ;;  %v4997_v8 = vsel %vm4023_vm7, %v4996_v46, 0.0 }
0x13e4   :  { %4998 = vadd.xlane.f32.xlu0 %v4997_v8  ;;  %v5008_v48 = vpop.permute.xlu1 %5007 }
0x13e5   :  { %v5010_v0 = vmul.f32 %v5008_v48, %v4963_v35  ;;  %v5004_v49 = vsel %vm4023_vm7, %v5003_v47, 0.0 }
0x13e6   :  { %v5015_v50 = vpop.permute.xlu0 %5014  ;;  %5005 = vadd.xlane.f32.xlu1 %v5004_v49 }
0x13e7   :  { %v5017_v51 = vmul.f32 %v5015_v50, %v4967_v36  ;;  %v5011_v52 = vsel %vm4023_vm7, %v5010_v0, 0.0 }
0x13e8   :  { %5012 = vadd.xlane.f32.xlu0 %v5011_v52  ;;  %v5022_v53 = vpop.permute.xlu1 %5021 }
0x13e9   :  { %v5024_v54 = vmul.f32 %v5022_v53, %v4969_v38  ;;  %v5018_v55 = vsel %vm4023_vm7, %v5017_v51, 0.0 }
0x13ea   :  { %5019 = vadd.xlane.f32.xlu1 %v5018_v55 }
0x13eb   :  { %v5025_v56 = vsel %vm4023_vm7, %v5024_v54, 0.0 }
0x13ec   :  { %5026 = vadd.xlane.f32.xlu0 %v5025_v56 }
0x13fb   :  { %5088 = vrot.lane.b32.xlu1 %v5087_v58, %s6998_s16 }
0x13ff   :  { %5333 = vrot.lane.b32.xlu1 %v5332_v59, %s6998_s16 }
0x1402   :  { %5171 = vrot.lane.b32.xlu0 %v5170_v60, %s6998_s16 }
0x1403   :  { %5495 = vrot.lane.b32.xlu1 %v5494_v61, %s6998_s16 }
0x1406   :  { %5252 = vrot.lane.b32.xlu0 %v5251_v62, %s6998_s16 }
0x1407   :  { %5657 = vrot.lane.b32.xlu1 %v5656_v37, %s6998_s16 }
0x140a   :  { %5414 = vrot.lane.b32.xlu0 %v5413_v43, %s6998_s16 }
0x140e   :  { %5576 = vrot.lane.b32.xlu0 %v5575_v19, %s6998_s16 }
0x1420   :  { %v4978_v63 = vpop.xlane.xlu0 %4977 }
0x1421   :  { %v5028_v1 = vmul.f32 0.17677669, %v4978_v63 }
0x1423   :  { %v5036_v4 = vsub.f32 %v5028_v1, %v5028_v1 }
0x1425   :  { %v5044_v9 = vmul.f32 1.442695, %v5036_v4 }
0x1427   :  { %v4985_v22 = vpop.xlane.xlu1 %4984  ;;  %6857 = vpow2.f32 %v5044_v9 }
0x1428   :  { %v5029_v3 = vmul.f32 0.17677669, %v4985_v22 }
0x142a   :  { %v5037_v6 = vsub.f32 %v5029_v3, %v5029_v3 }
0x142c   :  { %v5046_v12 = vmul.f32 1.442695, %v5037_v6 }
0x142e   :  { %6859 = vpow2.f32 %v5046_v12 }
0x1431   :  { %v6858_v15 = vpop.eup %6857 }
0x1432   :  { %6861 = vrcp.f32 %v6858_v15 }
0x1438   :  { %v6860_v16 = vpop.eup %6859 }
0x1439   :  { %6863 = vrcp.f32 %v6860_v16 }
0x143c   :  { %v6862_v35 = vpop.eup %6861 }
0x143d   :  { %v5076_v11 = vmul.f32 %v6862_v35, %v6858_v15  ;;  %v4847_v15 = vld [vmem:[%s7838_s4 + $0x28] sm:$0xff] }
0x1443   :  { %v6864_v41 = vpop.eup %6863 }
0x1444   :  { %v5077_v14 = vmul.f32 %v6864_v41, %v6860_v16  ;;  %v4848_v16 = vld [vmem:[%s7838_s4 + $0x30] sm:$0xff] }
0x146f   :  { %v4992_v17 = vpop.xlane.xlu1 %4991 }
0x1470   :  { %v5030_v18 = vmul.f32 0.17677669, %v4992_v17  ;;  %v6702_v17 = vpack.c.bf16 %v4848_v16, %v4847_v15 }
0x1471   :  { %v4999_v21 = vpop.xlane.xlu0 %4998 }
0x1472   :  { %v5038_v23 = vsub.f32 %v5030_v18, %v5030_v18  ;;  %v5031_v24 = vmul.f32 0.17677669, %v4999_v21 }
0x1473   :  { %v5006_v25 = vpop.xlane.xlu1 %5005 }
0x1474   :  { %v5048_v27 = vmul.f32 1.442695, %v5038_v23  ;;  %v5039_v28 = vsub.f32 %v5031_v24, %v5031_v24  ;;  %v5032_v29 = vmul.f32 0.17677669, %v5006_v25  ;;  %v4850_v23 = vld [vmem:[%s7838_s4 + $0x40] sm:$0xff] }
0x1475   :  { %v5013_v30 = vpop.xlane.xlu0 %5012 }
0x1476   :  { %6865 = vpow2.f32 %v5048_v27  ;;  %v5050_v31 = vmul.f32 1.442695, %v5039_v28  ;;  %v5040_v32 = vsub.f32 %v5032_v29, %v5032_v29  ;;  %v5033_v33 = vmul.f32 0.17677669, %v5013_v30 }
0x1477   :  { %v5020_v34 = vpop.xlane.xlu1 %5019 }
0x1478   :  { %6867 = vpow2.f32 %v5050_v31  ;;  %v5052_v36 = vmul.f32 1.442695, %v5040_v32  ;;  %v5041_v38 = vsub.f32 %v5033_v33, %v5033_v33  ;;  %v5034_v39 = vmul.f32 0.17677669, %v5020_v34 }
0x1479   :  { %v5027_v40 = vpop.xlane.xlu0 %5026 }
0x147a   :  { %6869 = vpow2.f32 %v5052_v36  ;;  %v5054_v42 = vmul.f32 1.442695, %v5041_v38  ;;  %v5042_v44 = vsub.f32 %v5034_v39, %v5034_v39  ;;  %v5035_v45 = vmul.f32 0.17677669, %v5027_v40 }
0x147b   :  { %v5089_v10 = vpop.permute.xlu1 %5088 }
0x147c   :  { %6871 = vpow2.f32 %v5054_v42  ;;  %v5056_v7 = vmul.f32 1.442695, %v5042_v44  ;;  %v5043_v46 = vsub.f32 %v5035_v45, %v5035_v45  ;;  %6590 = vmatpush3.msk.msra.mxu1 %vm5094_vm9, %v5089_v10 }
0x147d   :  { %6592 = vmatmul.mubr.msk.f32.vlgmr.msra.gmra.mrb[54].mxu1 %vm5090_vm10, %v5076_v11  ;;  %v5172_v2 = vpop.permute.xlu0 %5171  ;;  %6599 = vmatprep.subr.mxu1 %v6992_v5 }
0x147e   :  { %6873 = vpow2.f32 %v5056_v7  ;;  %v5058_v47 = vmul.f32 1.442695, %v5043_v46  ;;  %6595 = vmatpush3.msk.msra.mxu0 %vm5094_vm9, %v5172_v2  ;;  %6601 = vmatprep.mubr.msk.f32.mxu1 %vm6995_vm2, %v6992_v5 }
0x147f   :  { %v5334_v8 = vpop.permute.xlu1 %5333  ;;  %6597 = vmatmul.mubr.msk.f32.vlgmr.msra.gmra.mrb[58].mxu0 %vm5090_vm10, %v5077_v14  ;;  %6604 = vmatprep.subr.mxu0 %v6992_v5 }
0x1480   :  { %v6866_v48 = vpop.eup %6865  ;;  %6875 = vpow2.f32 %v5058_v47  ;;  %6605 = vmatpush3.msk.msra.mxu0 %vm5094_vm9, %v5334_v8  ;;  %6606 = vmatprep.mubr.msk.f32.mxu0 %vm6995_vm2, %v6992_v5  ;;  %v5855_v8 = vld [vmem:[%s7839_s5] sm:$0xff] }
0x1481   :  { %6877 = vrcp.f32 %v6866_v48  ;;  %v5253_v0 = vpop.permute.xlu0 %5252  ;;  %6614 = vmatprep.subr.mxu0 %v6992_v5 }
0x1482   :  { %v6868_v49 = vpop.eup %6867  ;;  %6600 = vmatpush3.msk.msra.mxu1 %vm5094_vm9, %v5253_v0 }
0x1483   :  { %6879 = vrcp.f32 %v6868_v49  ;;  %6609 = vmatprep.subr.mxu1 %v6992_v5  ;;  %v5496_v58 = vpop.permute.xlu1 %5495 }
0x1484   :  { %v6870_v50 = vpop.eup %6869 }
0x1485   :  { %6881 = vrcp.f32 %v6870_v50  ;;  %v5415_v55 = vpop.permute.xlu0 %5414 }
0x1486   :  { %v6872_v51 = vpop.eup %6871 }
0x1487   :  { %6883 = vrcp.f32 %v6872_v51  ;;  %v5658_v63 = vpop.permute.xlu1 %5657 }
0x1488   :  { %v6874_v52 = vpop.eup %6873 }
0x1489   :  { %6885 = vrcp.f32 %v6874_v52  ;;  %v5577_v37 = vpop.permute.xlu0 %5576 }
0x148a   :  { %v6876_v53 = vpop.eup %6875 }
0x148b   :  { %v6878_v54 = vpop.eup %6877  ;;  %6887 = vrcp.f32 %v6876_v53 }
0x148c   :  { %v5078_v56 = vmul.f32 %v6878_v54, %v6866_v48  ;;  %v5856_v48 = vld [vmem:[%s7839_s5 + $0x8] sm:$0xff] }
0x148d   :  { %v6880_v57 = vpop.eup %6879  ;;  %v6708_v0 = vpack.c.bf16 %v5856_v48, %v5855_v8 }
0x148e   :  { %6602 = vmatmul.mubr.msk.f32.vlgmr.msra.gmra.mrb[56].mxu1 %vm5090_vm10, %v5078_v56  ;;  %v5079_v59 = vmul.f32 %v6880_v57, %v6868_v49  ;;  %v5857_v49 = vld [vmem:[%s7839_s5 + $0x10] sm:$0xff] }
0x148f   :  { %v6882_v60 = vpop.eup %6881  ;;  %6610 = vmatpush3.msk.msra.mxu1 %vm5094_vm9, %v5415_v55  ;;  %6611 = vmatprep.mubr.msk.f32.mxu1 %vm6995_vm2, %v6992_v5 }
0x1490   :  { %6607 = vmatmul.mubr.msk.f32.vlgmr.msra.gmra.mrb[60].mxu0 %vm5090_vm10, %v5079_v59  ;;  %6619 = vmatprep.subr.mxu1 %v6992_v5  ;;  %v5080_v61 = vmul.f32 %v6882_v60, %v6870_v50  ;;  %v6101_v60 = vld [vmem:[%s7839_s5 + $0x20] ss:$0 sm:$0xff] }
0x1491   :  { %v6884_v62 = vpop.eup %6883  ;;  %6615 = vmatpush3.msk.msra.mxu0 %vm5094_vm9, %v5496_v58  ;;  %6616 = vmatprep.mubr.msk.f32.mxu0 %vm6995_vm2, %v6992_v5 }
0x1492   :  { %6612 = vmatmul.mubr.msk.f32.vlgmr.msra.gmra.mrb[58].mxu1 %vm5090_vm10, %v5080_v61  ;;  %6624 = vmatprep.subr.mxu0 %v6992_v5  ;;  %v5081_v43 = vmul.f32 %v6884_v62, %v6872_v51  ;;  %v6098_v51 = vld [vmem:[%s7838_s4 + $0x48] ss:$0 sm:$0xff] }
0x1493   :  { %v6886_v19 = vpop.eup %6885  ;;  %6620 = vmatpush3.msk.msra.mxu1 %vm5094_vm9, %v5577_v37  ;;  %6621 = vmatprep.mubr.msk.f32.mxu1 %vm6995_vm2, %v6992_v5 }
0x1494   :  { %6617 = vmatmul.mubr.msk.f32.vlgmr.msra.gmra.mrb[62].mxu0 %vm5090_vm10, %v5081_v43  ;;  %v5082_v22 = vmul.f32 %v6886_v19, %v6874_v52  ;;  %6701 = vmatprep.subr.bf16.mxu1 %v7001_v13 }
0x1495   :  { %v6888_v1 = vpop.eup %6887  ;;  %6625 = vmatpush3.msk.msra.mxu0 %vm5094_vm9, %v5658_v63  ;;  %6626 = vmatprep.mubr.msk.f32.mxu0 %vm6995_vm2, %v6992_v5 }
0x1496   :  { %6622 = vmatmul.mubr.msk.f32.vlgmr.msra.gmra.mrb[60].mxu1 %vm5090_vm10, %v5082_v22  ;;  %v5083_v3 = vmul.f32 %v6888_v1, %v6876_v53  ;;  %6707 = vmatprep.subr.bf16.mxu0 %v7001_v13 }
0x1497   :  { %6637 = vmatprep.mubr.msk.f32.mxu1 %vm6995_vm2, %v6992_v5  ;;  %6703 = vmatpush3.bf16.msra.mxu1 %v6702_v17 }
0x1498   :  { %6627 = vmatmul.mubr.msk.f32.vlgmr.msra.gmra.mrb[64].mxu0 %vm5090_vm10, %v5083_v3  ;;  %6704 = vmatprep.subr.bf16.mxu1 %v7001_v13 }
0x1499   :  { %6648 = vmatprep.mubr.msk.f32.mxu0 %vm6995_vm2, %v6992_v5  ;;  %v4849_v5 = vld [vmem:[%s7838_s4 + $0x38] sm:$0xff]  ;;  %6709 = vmatpush3.bf16.msra.mxu0 %v6708_v0  ;;  %s7003_s4 = smov [#allocation8]  }
0x149a   :  { %v6705_v25 = vpack.c.bf16 %v4850_v23, %v4849_v5  ;;  %6710 = vmatprep.subr.bf16.mxu0 %v7001_v13  ;;  %s5970_s21 = sshll.u32 %s7003_s4, 4  ;;  %s5971_s21 = int_to_ptr.vmem [resolvable:$true] %s5970_s21 }
0x149b   :  { %s6959_s22 = scalar_lea.vmem %s5971_s21, 32  ;;  %p6964_p11 = scmp.lt.s32.totalorder %s5971_s21, %s5971_s21 }
0x149c   :  { %6706 = vmatpush3.bf16.msra.mxu1 %v6705_v25  ;;  %p6960_p10 = scmp.ne.s32.totalorder %s5971_s21, %s6959_s22  ;;  %p6965_p12 = scmp.lt.s32.totalorder %s6959_s22, %s6959_s22 }
0x149e   :  { %p6966_p13 = por %p6965_p12, %p6964_p11 }
0x14a0   :  { %p6967_p0 = pnand %p6966_p13, %p6960_p10 }
0x1550   :  { %v5163_v4 = vpop.f32.mrb[54].mxu1 }
0x1551   :  { %v6593_v6 = vpop.f32.mrb[55].mxu1 }
0x1552   :  { %v5244_v9 = vpop.f32.mrb[58].mxu0 }
0x1553   :  { %v6598_v12 = vpop.f32.mrb[59].mxu0 }
0x1561   :  { %v5325_v18 = vpop.f32.mrb[56].mxu1 }
0x1562   :  { %5736 = vrot.lane.b32.xlu1 %v5325_v18, %s6990_s10  ;;  %v6603_v21 = vpop.f32.mrb[57].mxu1 }
0x1563   :  { %v5406_v24 = vpop.f32.mrb[60].mxu0 }
0x1564   :  { %v6608_v27 = vpop.f32.mrb[61].mxu0 }
0x1565   :  { %v5487_v28 = vpop.f32.mrb[58].mxu1 }
0x1566   :  { %v6613_v29 = vpop.f32.mrb[59].mxu1  ;;  %5738 = vrot.lane.b32.xlu1 %v5406_v24, %s6990_s10 }
0x1567   :  { %v5568_v30 = vpop.f32.mrb[62].mxu0 }
0x1568   :  { %5746 = vrot.lane.b32.xlu0 %v5568_v30, %s6999_s17  ;;  %v6618_v31 = vpop.f32.mrb[63].mxu0 }
0x1569   :  { %v5649_v32 = vpop.f32.mrb[60].mxu1 }
0x156a   :  { %v6623_v33 = vpop.f32.mrb[61].mxu1  ;;  %5744 = vrot.lane.b32.xlu1 %v5487_v28, %s6999_s17 }
0x156b   :  { %v5730_v34 = vpop.f32.mrb[64].mxu0 }
0x156c   :  { %5754 = vrot.lane.b32.xlu0 %v5730_v34, %s7000_s18  ;;  %v6628_v35 = vpop.f32.mrb[65].mxu0 }
0x1570   :  { %5752 = vrot.lane.b32.xlu0 %v5649_v32, %s7000_s18 }
0x15d4   :  { %v5737_v36 = vpop.permute.xlu1 %5736 }
0x15d5   :  { %v5758_v10 = vsel %vm180_vm3, %v5163_v4, %v5737_v36 }
0x15d8   :  { %v5739_v38 = vpop.permute.xlu1 %5738 }
0x15d9   :  { %v5759_v40 = vsel %vm180_vm3, %v5244_v9, %v5739_v38 }
0x15da   :  { %v5747_v39 = vpop.permute.xlu0 %5746 }
0x15db   :  { %v5761_v41 = vsel %vm1517_vm4, %v5759_v40, %v5747_v39 }
0x15dc   :  { %v5745_v44 = vpop.permute.xlu1 %5744 }
0x15dd   :  { %v5760_v11 = vsel %vm1517_vm4, %v5758_v10, %v5745_v44 }
0x15de   :  { %v5755_v42 = vpop.permute.xlu0 %5754 }
0x15df   :  { %v5763_v45 = vsel %vm1520_vm5, %v5761_v41, %v5755_v42 }
0x15e0   :  { %v5766_v7 = vrot.slane %v5763_v45, 7 }
0x15e2   :  { %v5753_v46 = vpop.permute.xlu0 %5752 }
0x15e3   :  { %v5762_v2 = vsel %vm1520_vm5, %v5760_v11, %v5753_v46 }
0x15e4   :  { %v5767_v14 = vsel %vm4753_vm8, %v5766_v7, %v5762_v2 }
0x15e5   :  { %v5769_v47 = vadd.f32 %v5767_v14, %v7692_v26  ;;  %v5858_v26 = vld [vmem:[%s7839_s5 + $0x18] sm:$0xff] }
0x15e6   :  { %v6711_v50 = vpack.c.bf16 %v5858_v26, %v5857_v49 }
0x15e7   :  { %6638 = vmatmul.mubr.msk.f32.vlgmr.msra.gmra.mrb[62].mxu1 %vm1529_vm6, %v5769_v47 }
0x15e8   :  { %6712 = vmatpush3.bf16.msra.mxu0 %v6711_v50 }
0x16ba   :  { %v5843_v52 = vpop.f32.mrb[62].mxu1 }
0x16bb   :  { %v5844_v53 = vadd.f32 %v6098_v51, %v5843_v52  ;;  %v6639_v54 = vpop.f32.mrb[63].mxu1 }
0x16bd   :  { %v6100_v55 = vmul.f32 -1.442695, %v5844_v53 }
0x16bf   :  { %6889 = vpow2.f32 %v6100_v55 }
0x16c9   :  { %v6890_v13 = vpop.eup %6889 }
0x16ca   :  { %v5850_v56 = vadd.f32 1.0, %v6890_v13 }
0x16cc   :  { %6891 = vrcp.f32 %v5850_v56 }
0x16d6   :  { %v6892_v57 = vpop.eup %6891 }
0x16d7   :  { %v5853_v58 = vmul.f32 %v6892_v57, %v5844_v53 }
0x16d9   :  { %v5854_v59 = vadd.f32 %v5853_v58, %v5769_v47 }
0x16db   :  { %6649 = vmatmul.mubr.msk.f32.vlgmr.msra.gmra.mrb[66].mxu0 %vm1529_vm6, %v5854_v59 }
0x17ae   :  { %v5933_v61 = vpop.f32.mrb[66].mxu0 }
0x17af   :  { %v5934_v62 = vadd.f32 %v6101_v60, %v5933_v61  ;;  %v6650_v37 = vpop.f32.mrb[67].mxu0 }
0x17b1   :  { %v5944_v43 = vrot.slane %v5934_v62, %v7491_v20 }
0x17b3   :  { %v5945_v19 = vcombine.high %v5944_v43, %v5944_v43  ;;  %v5952_v63 = vrot.slane %v5944_v43, %v7491_v20 }
0x17b5   :  { %v5959_v22 = vrot.slane %v5945_v19, %v7491_v20  ;;  %5963 = vst.msk [vmem:[#allocation8] sm:$0x1] %vm5962_vm11, %v5952_v63 }
0x17b7   :  { %5964 = vst.msk [vmem:[#allocation8 + $0x1] sm:$0x1] %vm5962_vm11, %v5959_v22 }
0x17b8   :  { %6970 = shalt.err (!%p6967_p0)
}
0x17b9   :  { %s6971_s25 = scalar_lea.hbm %s7840_s6, 32 }
0x17ba   :  { %p6972_p1 = scmp.ne.s32.totalorder %s7840_s6, %s6971_s25  ;;  %p6975_p2 = scmp.lt.u32.totalorder %s6971_s25, %s7840_s6 }
0x17bc   :  { %p6977_p3 = pnand %p6975_p2, %p6972_p1 }
0x17be   :  { %6980 = shalt.err (!%p6977_p3)
}
0x17bf   :  { %s7004_s30 = smov 1  }
0x17c0   :  { %5976 = dma.vmem_to_hbm [thread:$0]  %s5971_s21, 32, %s7840_s6, [#allocation4], %s6999_s17, %s6999_s17, %s7004_s30  }
0x17c1   :  { %6985 = dma.done.wait [#allocation4], 32  }
0x17c2   :  { %6986 = vsyncadd [#allocation4], 4294967264 }
0x17c3   :  { %5980 = vsyncpa [#allocation3], 1 }
0x17c4   :  { %5981 = vsyncpa [#allocation6], 1 }
0x17c5   :  { %5982 = vsyncpa [#allocation4], 1 }

</bundles_post_ra>
